<compile_context>
chip_gen: v7x
topology: tpu7x:2x2x1
jax: 0.10.0
libtpu: 0.0.40
codegen_flags: <defaults>
</compile_context>

<pallas_src>
import math

import jax
import jax.numpy as jnp
from jax import lax
from jax.experimental import pallas as pl
from jax.experimental.pallas import tpu as pltpu


# ---------------------------------------------------------------------------
# Pallas kernel 1: hoisted input projection
#   gates_x = x2d @ w_ih_t + (b_ih + b_hh)   as one big MXU-friendly GEMM
# ---------------------------------------------------------------------------
def _proj_kernel(x_ref, w_ref, b_ref, o_ref):
    o_ref[...] = (
        jnp.dot(x_ref[...], w_ref[...], preferred_element_type=jnp.float32)
        + b_ref[...])


def _pick_row_tile(m):
    for tm in (512, 256, 128, 64, 32, 16, 8):
        if m % tm == 0:
            return tm
    return m


def input_projection(x2d, w_t, b):
    """(M, K) @ (K, 4H) + (1, 4H) -> (M, 4H) f32, tiled over M."""
    m, k = x2d.shape
    n = w_t.shape[1]
    tm = _pick_row_tile(m)
    return pl.pallas_call(
        _proj_kernel,
        out_shape=jax.ShapeDtypeStruct((m, n), jnp.float32),
        grid_spec=pltpu.PrefetchScalarGridSpec(
            num_scalar_prefetch=0,
            grid=(m // tm,),
            in_specs=[
                pl.BlockSpec((tm, k), lambda i: (i, 0)),
                pl.BlockSpec((k, n), lambda i: (0, 0)),
                pl.BlockSpec((1, n), lambda i: (0, 0)),
            ],
            out_specs=pl.BlockSpec((tm, n), lambda i: (i, 0)),
        ),
        compiler_params=pltpu.CompilerParams(
            dimension_semantics=("parallel",)),
    )(x2d, w_t, b)


# ---------------------------------------------------------------------------
# Pallas kernel 2: fused 2-layer LSTM recurrence, whole sequence in one
# grid point.  Only the truly recurrent matmuls stay inside the time loop.
# ---------------------------------------------------------------------------
def _lstm2_recurrence_kernel(gx1_ref, whh1_ref, wih2_ref, whh2_ref, b2_ref,
                             hidden_ref, cell_ref):
    seq = gx1_ref.shape[0]
    batch = hidden_ref.shape[1]
    hid = hidden_ref.shape[2]

    # hoist the layer-2 bias broadcast out of the loop (JAX won't CSE it)
    b2 = jnp.broadcast_to(b2_ref[...], (batch, 4 * hid))

    def gate_math(gates, c_prev):
        # hid is a multiple of 128 -> each slice is whole lane registers
        i_g = jax.nn.sigmoid(gates[:, 0 * hid:1 * hid])
        f_g = jax.nn.sigmoid(gates[:, 1 * hid:2 * hid])
        g_g = jnp.tanh(gates[:, 2 * hid:3 * hid])
        o_g = jax.nn.sigmoid(gates[:, 3 * hid:4 * hid])
        c_new = f_g * c_prev + i_g * g_g
        h_new = o_g * jnp.tanh(c_new)
        return h_new, c_new

    def step(t, carry):
        h1, c1, h2, c2 = carry
        # layer 1: x-projection was precomputed; only h @ W_hh remains
        gates1 = gx1_ref[t] + jnp.dot(
            h1.astype(whh1_ref.dtype), whh1_ref[...],
            preferred_element_type=jnp.float32)
        h1, c1 = gate_math(gates1, c1)

        # layer 2: consumes layer-1 h(t) directly (no HBM round trip)
        gates2 = (
            jnp.dot(h1.astype(wih2_ref.dtype), wih2_ref[...],
                    preferred_element_type=jnp.float32)
            + jnp.dot(h2.astype(whh2_ref.dtype), whh2_ref[...],
                      preferred_element_type=jnp.float32)
            + b2)
        h2, c2 = gate_math(gates2, c2)
        return h1, c1, h2, c2

    zeros = jnp.zeros((batch, hid), jnp.float32)
    h1, c1, h2, c2 = lax.fori_loop(0, seq, step, (zeros, zeros, zeros, zeros))

    # single lane-dense store of the final states only
    hidden_ref[0] = h1
    hidden_ref[1] = h2
    cell_ref[0] = c1
    cell_ref[1] = c2


def lstm2_recurrence(gx1, whh1, wih2, whh2, b2):
    seq, batch, four_h = gx1.shape
    hid = four_h // 4

    def full(shape):
        return pl.BlockSpec(shape, lambda i, _s=len(shape): (0,) * _s)

    out_shapes = (
        jax.ShapeDtypeStruct((2, batch, hid), jnp.float32),   # hidden
        jax.ShapeDtypeStruct((2, batch, hid), jnp.float32),   # cell
    )
    return pl.pallas_call(
        _lstm2_recurrence_kernel,
        out_shape=out_shapes,
        grid_spec=pltpu.PrefetchScalarGridSpec(
            num_scalar_prefetch=0,
            grid=(1,),
            in_specs=[
                full((seq, batch, four_h)),
                full(whh1.shape),
                full(wih2.shape),
                full(whh2.shape),
                full(b2.shape),
            ],
            out_specs=[
                full((2, batch, hid)),
                full((2, batch, hid)),
            ],
        ),
        compiler_params=pltpu.CompilerParams(
            dimension_semantics=("arbitrary",)),   # serial recurrence
    )(gx1, whh1, wih2, whh2, b2)


# ---------------------------------------------------------------------------
# Encoder forward (embedding gather + reshapes in JAX glue; hot path in Pallas)
# ---------------------------------------------------------------------------
def encoder_forward(params, src):
    seq, batch = src.shape
    # embedding: (seq, batch) -> (seq, batch, emb_dim)
    emb = jnp.take(params["embedding"], src, axis=0)
    # nn.Dropout at eval time -> identity

    # pad batch up to a sublane multiple so all tiles are unmasked
    batch_p = ((batch + 7) // 8) * 8
    if batch_p != batch:
        emb = jnp.pad(emb, ((0, 0), (0, batch_p - batch), (0, 0)))

    l1, l2 = params["l1"], params["l2"]
    emb_dim = emb.shape[-1]
    hid = l1["w_hh_t"].shape[0]

    # hoisted layer-1 input projection: one big GEMM over all timesteps
    gx1 = input_projection(emb.reshape(seq * batch_p, emb_dim),
                           l1["w_ih_t"], l1["b"])
    gx1 = gx1.reshape(seq, batch_p, 4 * hid)

    hidden, cell = lstm2_recurrence(gx1, l1["w_hh_t"], l2["w_ih_t"],
                                    l2["w_hh_t"], l2["b"])
    return hidden[:, :batch, :], cell[:, :batch, :]


# ---------------------------------------------------------------------------
# Pure-JAX reference (lax.scan) with numerics matched to the kernel
# (bf16 MXU operands for the recurrent dots, f32 accumulation/elementwise)
# ---------------------------------------------------------------------------
def encoder_forward_ref(params, src):
    emb = jnp.take(params["embedding"], src, axis=0)
    l1, l2 = params["l1"], params["l2"]
    hid = l1["w_hh_t"].shape[0]
    batch = src.shape[1]

    gx1 = emb @ l1["w_ih_t"] + l1["b"]           # (seq, batch, 4H) f32

    def gate_math(gates, c_prev):
        i_g = jax.nn.sigmoid(gates[:, 0 * hid:1 * hid])
        f_g = jax.nn.sigmoid(gates[:, 1 * hid:2 * hid])
        g_g = jnp.tanh(gates[:, 2 * hid:3 * hid])
        o_g = jax.nn.sigmoid(gates[:, 3 * hid:4 * hid])
        c_new = f_g * c_prev + i_g * g_g
        return o_g * jnp.tanh(c_new), c_new

    def step(carry, gx1_t):
        h1, c1, h2, c2 = carry
        gates1 = gx1_t + jnp.dot(h1.astype(jnp.bfloat16), l1["w_hh_t"],
                                 preferred_element_type=jnp.float32)
        h1, c1 = gate_math(gates1, c1)
        gates2 = (jnp.dot(h1.astype(jnp.bfloat16), l2["w_ih_t"],
                          preferred_element_type=jnp.float32)
                  + jnp.dot(h2.astype(jnp.bfloat16), l2["w_hh_t"],
                            preferred_element_type=jnp.float32)
                  + l2["b"])
        h2, c2 = gate_math(gates2, c2)
        return (h1, c1, h2, c2), None

    z = jnp.zeros((batch, hid), jnp.float32)
    (h1, c1, h2, c2), _ = lax.scan(step, (z, z, z, z), gx1)
    return jnp.stack([h1, h2], 0), jnp.stack([c1, c2], 0)


# ---------------------------------------------------------------------------
# Deterministic parameter init (shapes follow nn.Embedding / nn.LSTM)
# ---------------------------------------------------------------------------
def init_params(key, input_dim, emb_dim, hid_dim):
    ks = jax.random.split(key, 9)
    bound = 1.0 / math.sqrt(hid_dim)

    def u(k, shape):
        return jax.random.uniform(k, shape, jnp.float32, -bound, bound)

    emb_w = jax.random.normal(ks[0], (input_dim, emb_dim), jnp.float32)
    # PyTorch stores weight_ih (4H, in), weight_hh (4H, H); keep transposed
    # copies so the kernels do x @ W without in-kernel transposes.
    w_ih1 = u(ks[1], (4 * hid_dim, emb_dim))
    w_hh1 = u(ks[2], (4 * hid_dim, hid_dim))
    b1 = u(ks[3], (4 * hid_dim,)) + u(ks[4], (4 * hid_dim,))
    w_ih2 = u(ks[5], (4 * hid_dim, hid_dim))
    w_hh2 = u(ks[6], (4 * hid_dim, hid_dim))
    b2 = u(ks[7], (4 * hid_dim,)) + u(ks[8], (4 * hid_dim,))

    return {
        "embedding": emb_w,
        "l1": {
            "w_ih_t": w_ih1.T,                          # (E, 4H) f32 (big GEMM)
            "w_hh_t": w_hh1.T.astype(jnp.bfloat16),     # (H, 4H) bf16 MXU operand
            "b": b1[None, :],                           # (1, 4H) f32 (folded once)
        },
        "l2": {
            "w_ih_t": w_ih2.T.astype(jnp.bfloat16),     # (H, 4H) bf16
            "w_hh_t": w_hh2.T.astype(jnp.bfloat16),     # (H, 4H) bf16
            "b": b2[None, :],                           # (1, 4H) f32
        },
    }


if __name__ == "__main__":
    # Small, hardware-aligned shapes consistent with the module's forward:
    # src is (seq_len, batch) int token ids; batch = 8 (sublane multiple),
    # emb/hid = 128 (lane multiples), 2 LSTM layers.
    SEQ, BATCH = 16, 8
    VOCAB, EMB, HID, N_LAYERS = 100, 128, 128, 2

    key = jax.random.PRNGKey(0)
    k_param, k_src = jax.random.split(key)
    params = init_params(k_param, VOCAB, EMB, HID)
    src = jax.random.randint(k_src, (SEQ, BATCH), 1, VOCAB, dtype=jnp.int32)

    hidden, cell = jax.jit(encoder_forward)(params, src)
    jax.block_until_ready((hidden, cell))

    # correctness check against numerics-matched pure-JAX reference
    hidden_ref, cell_ref = jax.jit(encoder_forward_ref)(params, src)
    assert hidden.shape == (N_LAYERS, BATCH, HID)
    assert cell.shape == (N_LAYERS, BATCH, HID)
    assert jnp.allclose(hidden, hidden_ref, atol=1e-4, rtol=1e-4), \
        float(jnp.max(jnp.abs(hidden - hidden_ref)))
    assert jnp.allclose(cell, cell_ref, atol=1e-4, rtol=1e-4), \
        float(jnp.max(jnp.abs(cell - cell_ref)))

    print("KERNEL_OK")
</pallas_src>

<mosaic_0001>
module attributes {stable_mosaic.version = 11 : i64} {
  func.func @_proj_kernel(%arg0: i32, %arg1: memref<128x128xf32, #tpu.memory_space<vmem>>, %arg2: memref<128x512xf32, #tpu.memory_space<vmem>>, %arg3: memref<1x512xf32, #tpu.memory_space<vmem>>, %arg4: memref<128x512xf32, #tpu.memory_space<vmem>>) attributes {dimension_semantics = [#tpu.dimension_semantics<parallel>], iteration_bounds = array<i64: 1>, scalar_prefetch = 0 : i64, scratch_operands = 0 : i64, tpu.core_type = #tpu.core_type<tc>, window_params = [{transform_indices = @transform_0, window_bounds = array<i64: 128, 128>}, {pipeline_mode = #tpu.pipeline_mode<synchronous>, transform_indices = @transform_1, window_bounds = array<i64: 128, 512>}, {pipeline_mode = #tpu.pipeline_mode<synchronous>, transform_indices = @transform_2, window_bounds = array<i64: 1, 512>}, {transform_indices = @transform_3, window_bounds = array<i64: 128, 512>}]} {
    %c0 = arith.constant 0 : index
    %c0_0 = arith.constant 0 : index
    %0 = vector.load %arg1[%c0, %c0_0] : memref<128x128xf32, #tpu.memory_space<vmem>>, vector<128x128xf32>
    %c0_1 = arith.constant 0 : index
    %c0_2 = arith.constant 0 : index
    %1 = vector.load %arg2[%c0_1, %c0_2] : memref<128x512xf32, #tpu.memory_space<vmem>>, vector<128x512xf32>
    %cst = arith.constant dense<0.000000e+00> : vector<128x512xf32>
    %2 = tpu.matmul %0, %1, %cst {dimension_numbers = #tpu.dot_dimension_numbers<[1], [0], [0], [1], [0, 0, 1, 1], [], []>} : vector<128x128xf32>, vector<128x512xf32>, vector<128x512xf32> -> vector<128x512xf32>
    %c0_3 = arith.constant 0 : index
    %c0_4 = arith.constant 0 : index
    %3 = vector.load %arg3[%c0_3, %c0_4] : memref<1x512xf32, #tpu.memory_space<vmem>>, vector<1x512xf32>
    %4 = vector.broadcast %3 : vector<1x512xf32> to vector<128x512xf32>
    %5 = arith.addf %2, %4 : vector<128x512xf32>
    %c0_5 = arith.constant 0 : index
    %c0_6 = arith.constant 0 : index
    %6 = vector.load %arg4[%c0_5, %c0_6] : memref<128x512xf32, #tpu.memory_space<vmem>>, vector<128x512xf32>
    tpu.vector_store %arg4[%c0_5, %c0_6], %5 {strides = array<i32>} : memref<128x512xf32, #tpu.memory_space<vmem>>, vector<128x512xf32>,
    return
  }
  func.func @transform_0(%arg0: i32) -> (i32, i32) {
    %c0_i32 = arith.constant 0 : i32
    %c0_i32_0 = arith.constant 0 : i32
    return %arg0, %c0_i32 : i32, i32
  }
  func.func @transform_1(%arg0: i32) -> (i32, i32) {
    %c0_i32 = arith.constant 0 : i32
    %c0_i32_0 = arith.constant 0 : i32
    %c0_i32_1 = arith.constant 0 : i32
    return %c0_i32, %c0_i32_0 : i32, i32
  }
  func.func @transform_2(%arg0: i32) -> (i32, i32) {
    %c0_i32 = arith.constant 0 : i32
    %c0_i32_0 = arith.constant 0 : i32
    %c0_i32_1 = arith.constant 0 : i32
    return %c0_i32, %c0_i32_0 : i32, i32
  }
  func.func @transform_3(%arg0: i32) -> (i32, i32) {
    %c0_i32 = arith.constant 0 : i32
    %c0_i32_0 = arith.constant 0 : i32
    return %arg0, %c0_i32 : i32, i32
  }
}

module attributes {stable_mosaic.version = 11 : i64} {
  func.func @_lstm2_recurrence_kernel(%arg0: i32, %arg1: memref<16x8x512xf32, #tpu.memory_space<vmem>>, %arg2: memref<128x512xbf16, #tpu.memory_space<vmem>>, %arg3: memref<128x512xbf16, #tpu.memory_space<vmem>>, %arg4: memref<128x512xbf16, #tpu.memory_space<vmem>>, %arg5: memref<1x512xf32, #tpu.memory_space<vmem>>, %arg6: memref<2x8x128xf32, #tpu.memory_space<vmem>>, %arg7: memref<2x8x128xf32, #tpu.memory_space<vmem>>) attributes {dimension_semantics = [#tpu.dimension_semantics<arbitrary>], iteration_bounds = array<i64: 1>, scalar_prefetch = 0 : i64, scratch_operands = 0 : i64, tpu.core_type = #tpu.core_type<tc>, window_params = [{pipeline_mode = #tpu.pipeline_mode<synchronous>, transform_indices = @transform_0, window_bounds = array<i64: 16, 8, 512>}, {pipeline_mode = #tpu.pipeline_mode<synchronous>, transform_indices = @transform_1, window_bounds = array<i64: 128, 512>}, {pipeline_mode = #tpu.pipeline_mode<synchronous>, transform_indices = @transform_2, window_bounds = array<i64: 128, 512>}, {pipeline_mode = #tpu.pipeline_mode<synchronous>, transform_indices = @transform_3, window_bounds = array<i64: 128, 512>}, {pipeline_mode = #tpu.pipeline_mode<synchronous>, transform_indices = @transform_4, window_bounds = array<i64: 1, 512>}, {pipeline_mode = #tpu.pipeline_mode<synchronous>, transform_indices = @transform_5, window_bounds = array<i64: 2, 8, 128>}, {pipeline_mode = #tpu.pipeline_mode<synchronous>, transform_indices = @transform_6, window_bounds = array<i64: 2, 8, 128>}]} {
    %c0 = arith.constant 0 : index
    %c0_0 = arith.constant 0 : index
    %0 = vector.load %arg5[%c0, %c0_0] : memref<1x512xf32, #tpu.memory_space<vmem>>, vector<1x512xf32>
    %1 = vector.shape_cast %0 : vector<1x512xf32> to vector<1x512xf32>
    %2 = vector.broadcast %1 : vector<1x512xf32> to vector<8x512xf32>
    %cst = arith.constant 0.000000e+00 : f32
    %3 = vector.broadcast %cst : f32 to vector<8x128xf32>
    %c0_i32 = arith.constant 0 : i32
    %c16_i32 = arith.constant 16 : i32
    %4 = arith.addi %c0_i32, %c16_i32 : i32
    %c1_i32 = arith.constant 1 : i32
    %5:4 = scf.for %arg8 = %c0_i32 to %4 step %c1_i32 iter_args(%arg9 = %3, %arg10 = %3, %arg11 = %3, %arg12 = %3) -> (vector<8x128xf32>, vector<8x128xf32>, vector<8x128xf32>, vector<8x128xf32>)  : i32 {
      %18 = arith.index_cast %arg8 : i32 to index
      %c0_13 = arith.constant 0 : index
      %c0_14 = arith.constant 0 : index
      %19 = vector.load %arg1[%18, %c0_13, %c0_14] : memref<16x8x512xf32, #tpu.memory_space<vmem>>, vector<1x8x512xf32>
      %20 = vector.shape_cast %19 : vector<1x8x512xf32> to vector<8x512xf32>
      %21 = arith.truncf %arg9 : vector<8x128xf32> to vector<8x128xbf16>
      %c0_15 = arith.constant 0 : index
      %c0_16 = arith.constant 0 : index
      %22 = vector.load %arg2[%c0_15, %c0_16] : memref<128x512xbf16, #tpu.memory_space<vmem>>, vector<128x512xbf16>
      %cst_17 = arith.constant dense<0.000000e+00> : vector<8x512xf32>
      %23 = tpu.matmul %21, %22, %cst_17 {dimension_numbers = #tpu.dot_dimension_numbers<[1], [0], [0], [1], [0, 0, 1, 1], [], []>} : vector<8x128xbf16>, vector<128x512xbf16>, vector<8x512xf32> -> vector<8x512xf32>
      %24 = arith.addf %20, %23 : vector<8x512xf32>
      %25 = vector.extract_strided_slice %24 {offsets = [0, 0], sizes = [8, 128], strides = [1, 1]} : vector<8x512xf32> to vector<8x128xf32>
      %26 = arith.negf %25 : vector<8x128xf32>
      %27 = math.exp %26 : vector<8x128xf32>
      %cst_18 = arith.constant 1.000000e+00 : f32
      %28 = vector.broadcast %cst_18 : f32 to vector<8x128xf32>
      %29 = arith.addf %28, %27 : vector<8x128xf32>
      %30 = arith.divf %28, %29 : vector<8x128xf32>
      %31 = vector.extract_strided_slice %24 {offsets = [0, 128], sizes = [8, 128], strides = [1, 1]} : vector<8x512xf32> to vector<8x128xf32>
      %32 = arith.negf %31 : vector<8x128xf32>
      %33 = math.exp %32 : vector<8x128xf32>
      %cst_19 = arith.constant 1.000000e+00 : f32
      %34 = vector.broadcast %cst_19 : f32 to vector<8x128xf32>
      %35 = arith.addf %34, %33 : vector<8x128xf32>
      %36 = arith.divf %34, %35 : vector<8x128xf32>
      %37 = vector.extract_strided_slice %24 {offsets = [0, 256], sizes = [8, 128], strides = [1, 1]} : vector<8x512xf32> to vector<8x128xf32>
      %38 = math.tanh %37 : vector<8x128xf32>
      %39 = vector.extract_strided_slice %24 {offsets = [0, 384], sizes = [8, 128], strides = [1, 1]} : vector<8x512xf32> to vector<8x128xf32>
      %40 = arith.negf %39 : vector<8x128xf32>
      %41 = math.exp %40 : vector<8x128xf32>
      %cst_20 = arith.constant 1.000000e+00 : f32
      %42 = vector.broadcast %cst_20 : f32 to vector<8x128xf32>
      %43 = arith.addf %42, %41 : vector<8x128xf32>
      %44 = arith.divf %42, %43 : vector<8x128xf32>
      %45 = arith.mulf %36, %arg10 : vector<8x128xf32>
      %46 = arith.mulf %30, %38 : vector<8x128xf32>
      %47 = arith.addf %45, %46 : vector<8x128xf32>
      %48 = math.tanh %47 : vector<8x128xf32>
      %49 = arith.mulf %44, %48 : vector<8x128xf32>
      %50 = arith.truncf %49 : vector<8x128xf32> to vector<8x128xbf16>
      %c0_21 = arith.constant 0 : index
      %c0_22 = arith.constant 0 : index
      %51 = vector.load %arg3[%c0_21, %c0_22] : memref<128x512xbf16, #tpu.memory_space<vmem>>, vector<128x512xbf16>
      %cst_23 = arith.constant dense<0.000000e+00> : vector<8x512xf32>
      %52 = tpu.matmul %50, %51, %cst_23 {dimension_numbers = #tpu.dot_dimension_numbers<[1], [0], [0], [1], [0, 0, 1, 1], [], []>} : vector<8x128xbf16>, vector<128x512xbf16>, vector<8x512xf32> -> vector<8x512xf32>
      %53 = arith.truncf %arg11 : vector<8x128xf32> to vector<8x128xbf16>
      %c0_24 = arith.constant 0 : index
      %c0_25 = arith.constant 0 : index
      %54 = vector.load %arg4[%c0_24, %c0_25] : memref<128x512xbf16, #tpu.memory_space<vmem>>, vector<128x512xbf16>
      %cst_26 = arith.constant dense<0.000000e+00> : vector<8x512xf32>
      %55 = tpu.matmul %53, %54, %cst_26 {dimension_numbers = #tpu.dot_dimension_numbers<[1], [0], [0], [1], [0, 0, 1, 1], [], []>} : vector<8x128xbf16>, vector<128x512xbf16>, vector<8x512xf32> -> vector<8x512xf32>
      %56 = arith.addf %52, %55 : vector<8x512xf32>
      %57 = arith.addf %56, %2 : vector<8x512xf32>
      %58 = vector.extract_strided_slice %57 {offsets = [0, 0], sizes = [8, 128], strides = [1, 1]} : vector<8x512xf32> to vector<8x128xf32>
      %59 = arith.negf %58 : vector<8x128xf32>
      %60 = math.exp %59 : vector<8x128xf32>
      %cst_27 = arith.constant 1.000000e+00 : f32
      %61 = vector.broadcast %cst_27 : f32 to vector<8x128xf32>
      %62 = arith.addf %61, %60 : vector<8x128xf32>
      %63 = arith.divf %61, %62 : vector<8x128xf32>
      %64 = vector.extract_strided_slice %57 {offsets = [0, 128], sizes = [8, 128], strides = [1, 1]} : vector<8x512xf32> to vector<8x128xf32>
      %65 = arith.negf %64 : vector<8x128xf32>
      %66 = math.exp %65 : vector<8x128xf32>
      %cst_28 = arith.constant 1.000000e+00 : f32
      %67 = vector.broadcast %cst_28 : f32 to vector<8x128xf32>
      %68 = arith.addf %67, %66 : vector<8x128xf32>
      %69 = arith.divf %67, %68 : vector<8x128xf32>
      %70 = vector.extract_strided_slice %57 {offsets = [0, 256], sizes = [8, 128], strides = [1, 1]} : vector<8x512xf32> to vector<8x128xf32>
      %71 = math.tanh %70 : vector<8x128xf32>
      %72 = vector.extract_strided_slice %57 {offsets = [0, 384], sizes = [8, 128], strides = [1, 1]} : vector<8x512xf32> to vector<8x128xf32>
      %73 = arith.negf %72 : vector<8x128xf32>
      %74 = math.exp %73 : vector<8x128xf32>
      %cst_29 = arith.constant 1.000000e+00 : f32
      %75 = vector.broadcast %cst_29 : f32 to vector<8x128xf32>
      %76 = arith.addf %75, %74 : vector<8x128xf32>
      %77 = arith.divf %75, %76 : vector<8x128xf32>
      %78 = arith.mulf %69, %arg12 : vector<8x128xf32>
      %79 = arith.mulf %63, %71 : vector<8x128xf32>
      %80 = arith.addf %78, %79 : vector<8x128xf32>
      %81 = math.tanh %80 : vector<8x128xf32>
      %82 = arith.mulf %77, %81 : vector<8x128xf32>
      scf.yield %49, %47, %82, %80 : vector<8x128xf32>, vector<8x128xf32>, vector<8x128xf32>, vector<8x128xf32>
    }
    %c16_i32_1 = arith.constant 16 : i32
    %c0_2 = arith.constant 0 : index
    %c0_3 = arith.constant 0 : index
    %c0_4 = arith.constant 0 : index
    %6 = vector.load %arg6[%c0_2, %c0_3, %c0_4] : memref<2x8x128xf32, #tpu.memory_space<vmem>>, vector<1x8x128xf32>
    %7 = vector.shape_cast %6 : vector<1x8x128xf32> to vector<8x128xf32>
    %8 = vector.shape_cast %5#0 : vector<8x128xf32> to vector<1x8x128xf32>
    tpu.vector_store %arg6[%c0_2, %c0_3, %c0_4], %8 {strides = array<i32>} : memref<2x8x128xf32, #tpu.memory_space<vmem>>, vector<1x8x128xf32>,
    %c1 = arith.constant 1 : index
    %c0_5 = arith.constant 0 : index
    %c0_6 = arith.constant 0 : index
    %9 = vector.load %arg6[%c1, %c0_5, %c0_6] : memref<2x8x128xf32, #tpu.memory_space<vmem>>, vector<1x8x128xf32>
    %10 = vector.shape_cast %9 : vector<1x8x128xf32> to vector<8x128xf32>
    %11 = vector.shape_cast %5#2 : vector<8x128xf32> to vector<1x8x128xf32>
    tpu.vector_store %arg6[%c1, %c0_5, %c0_6], %11 {strides = array<i32>} : memref<2x8x128xf32, #tpu.memory_space<vmem>>, vector<1x8x128xf32>,
    %c0_7 = arith.constant 0 : index
    %c0_8 = arith.constant 0 : index
    %c0_9 = arith.constant 0 : index
    %12 = vector.load %arg7[%c0_7, %c0_8, %c0_9] : memref<2x8x128xf32, #tpu.memory_space<vmem>>, vector<1x8x128xf32>
    %13 = vector.shape_cast %12 : vector<1x8x128xf32> to vector<8x128xf32>
    %14 = vector.shape_cast %5#1 : vector<8x128xf32> to vector<1x8x128xf32>
    tpu.vector_store %arg7[%c0_7, %c0_8, %c0_9], %14 {strides = array<i32>} : memref<2x8x128xf32, #tpu.memory_space<vmem>>, vector<1x8x128xf32>,
    %c1_10 = arith.constant 1 : index
    %c0_11 = arith.constant 0 : index
    %c0_12 = arith.constant 0 : index
    %15 = vector.load %arg7[%c1_10, %c0_11, %c0_12] : memref<2x8x128xf32, #tpu.memory_space<vmem>>, vector<1x8x128xf32>
    %16 = vector.shape_cast %15 : vector<1x8x128xf32> to vector<8x128xf32>
    %17 = vector.shape_cast %5#3 : vector<8x128xf32> to vector<1x8x128xf32>
    tpu.vector_store %arg7[%c1_10, %c0_11, %c0_12], %17 {strides = array<i32>} : memref<2x8x128xf32, #tpu.memory_space<vmem>>, vector<1x8x128xf32>,
    return
  }
  func.func @transform_0(%arg0: i32) -> (i32, i32, i32) {
    %c0_i32 = arith.constant 0 : i32
    %c0_i32_0 = arith.constant 0 : i32
    %c0_i32_1 = arith.constant 0 : i32
    %c0_i32_2 = arith.constant 0 : i32
    return %c0_i32, %c0_i32_0, %c0_i32_1 : i32, i32, i32
  }
  func.func @transform_1(%arg0: i32) -> (i32, i32) {
    %c0_i32 = arith.constant 0 : i32
    %c0_i32_0 = arith.constant 0 : i32
    %c0_i32_1 = arith.constant 0 : i32
    return %c0_i32, %c0_i32_0 : i32, i32
  }
  func.func @transform_2(%arg0: i32) -> (i32, i32) {
    %c0_i32 = arith.constant 0 : i32
    %c0_i32_0 = arith.constant 0 : i32
    %c0_i32_1 = arith.constant 0 : i32
    return %c0_i32, %c0_i32_0 : i32, i32
  }
  func.func @transform_3(%arg0: i32) -> (i32, i32) {
    %c0_i32 = arith.constant 0 : i32
    %c0_i32_0 = arith.constant 0 : i32
    %c0_i32_1 = arith.constant 0 : i32
    return %c0_i32, %c0_i32_0 : i32, i32
  }
  func.func @transform_4(%arg0: i32) -> (i32, i32) {
    %c0_i32 = arith.constant 0 : i32
    %c0_i32_0 = arith.constant 0 : i32
    %c0_i32_1 = arith.constant 0 : i32
    return %c0_i32, %c0_i32_0 : i32, i32
  }
  func.func @transform_5(%arg0: i32) -> (i32, i32, i32) {
    %c0_i32 = arith.constant 0 : i32
    %c0_i32_0 = arith.constant 0 : i32
    %c0_i32_1 = arith.constant 0 : i32
    %c0_i32_2 = arith.constant 0 : i32
    return %c0_i32, %c0_i32_0, %c0_i32_1 : i32, i32, i32
  }
  func.func @transform_6(%arg0: i32) -> (i32, i32, i32) {
    %c0_i32 = arith.constant 0 : i32
    %c0_i32_0 = arith.constant 0 : i32
    %c0_i32_1 = arith.constant 0 : i32
    %c0_i32_2 = arith.constant 0 : i32
    return %c0_i32, %c0_i32_0, %c0_i32_1 : i32, i32, i32
  }
}

</mosaic_0001>

<bundles_post_ra>
// kernel: encoder_forward.3
= control target key start
LH: loop header
LB: loop body
LE: loop exit
PB: predicated region body
PF: predicated region fallthrough
CT: control target
= control target key end

     0   :  { %12 = vsyncpa [#allocation3], 0  ;;  %s1840_s0 = inlined_call_operand.vmem [shape: f32[16,8,512], index: 0, kind: input, shape index: {}]   ;;  %s1841_s1 = inlined_call_operand.vmem [shape: bf16[128,512], index: 1, kind: input, shape index: {}]   ;;  %s1842_s2 = inlined_call_operand.vmem [shape: bf16[128,512], index: 2, kind: input, shape index: {}]   ;;  %s1843_s3 = inlined_call_operand.vmem [shape: bf16[128,512], index: 3, kind: input, shape index: {}]   ;;  %s1844_s4 = inlined_call_operand.vmem [shape: f32[1,512], index: 4, kind: input, shape index: {}]   ;;  %s1845_s5 = inlined_call_operand.hbm [shape: f32[2,8,128], index: 5, kind: output, shape index: {0}]   ;;  %s1846_s6 = inlined_call_operand.hbm [shape: f32[2,8,128], index: 6, kind: output, shape index: {1}]  }
   0x1   :  { %13 = vsyncpa [#allocation5], 0  ;;  %v27_v0 = vlaneseq  ;;  %v25_v2 = vld [vmem:[%s1844_s4] sm:$0xf]  ;;  %v1467_v11 = vmov 0.0   ;;  %v1469_v12 = vmov 0.0  }
   0x2   :  { %v1471_v13 = vmov 0.0   ;;  %v1473_v14 = vmov 0.0   ;;  %s1475_s4 = smov 0  }
   0x3   :  { %v28_v1 = vshrl.u32 %v27_v0, 7 }
   0x5   :  { %v29_v3 = vsub.s32 0, %v28_v1  ;;  %v33_v4 = vsub.s32 1, %v28_v1  ;;  %v37_v5 = vsub.s32 2, %v28_v1  ;;  %v41_v6 = vsub.s32 3, %v28_v1 }
   0x7   :  { %v1459_v7 = vrot.slane %v25_v2, %v29_v3  ;;  %v1461_v8 = vrot.slane %v25_v2, %v33_v4  ;;  %v1463_v9 = vrot.slane %v25_v2, %v37_v5  ;;  %v1465_v10 = vrot.slane %v25_v2, %v41_v6 }
   0x8 LB: > { %v1152_v15 = vld [vmem:[%s1841_s1 + $0x4] ss:$16 sps:$4 sm:$0xff]   ;;  %v1154_v16 = vld [vmem:[%s1841_s1] ss:$16 sps:$4 sm:$0xff]   ;;  %v1416_v17 = vmov 0   ;;  %v64_v48 = vpack.c.bf16 %v1410_v14, %v1410_v14  ;;  %s1106_s23 = sshll.u32 %s1414_s4, 5  ;;  %s1414_s4 = sphi %s1475_s4, %s52_s4   ;;  %v1410_v14 = vphi %v1473_v14, %v1851_v14   ;;  %v1406_v13 = vphi %v1471_v13, %v1850_v13   ;;  %v1402_v12 = vphi %v1469_v12, %v1849_v12   ;;  %v1398_v11 = vphi %v1467_v11, %v1848_v11  }
   0x9   : > { %289 = vmatprep.mubr.bf16.mxu0 %v1416_v17  ;;  %330 = vmatprep.mubr.bf16.mxu1 %v1416_v17  ;;  %v1155_v18 = vld [vmem:[%s1841_s1 + $0x24] ss:$16 sps:$4 sm:$0xff]   ;;  %v1157_v19 = vld [vmem:[%s1841_s1 + $0x20] ss:$16 sps:$4 sm:$0xff]   ;;  %v1163_v21 = vld [vmem:[%s1841_s1 + $0xc] ss:$16 sps:$4 sm:$0xff]   ;;  %s59_s26 = scalar_lea.vmem %s1840_s0, %s1106_s23 }
   0xa   : > { %257 = vmatprep.subr.bf16.mxu0 %v1152_v15  ;;  %v1158_v20 = vld [vmem:[%s1841_s1 + $0x44] ss:$16 sps:$4 sm:$0xff]   ;;  %v1166_v22 = vld [vmem:[%s1841_s1 + $0x8] ss:$16 sps:$4 sm:$0xff]   ;;  %v1160_v23 = vld [vmem:[%s1841_s1 + $0x40] ss:$16 sps:$4 sm:$0xff]   ;;  %298 = vmatprep.subr.bf16.mxu1 %v1163_v21 }
   0xb   : > { %258 = vmatpush1.bf16.msra.mxu0 %v1154_v16  ;;  %v1161_v24 = vld [vmem:[%s1841_s1 + $0x64] ss:$16 sps:$4 sm:$0xff]   ;;  %299 = vmatpush1.bf16.msra.mxu1 %v1166_v22  ;;  %v1169_v25 = vld [vmem:[%s1841_s1 + $0x2c] ss:$16 sps:$4 sm:$0xff]   ;;  %v1172_v26 = vld [vmem:[%s1841_s1 + $0x28] ss:$16 sps:$4 sm:$0xff]  }
   0xc   : > { %259 = vmatprep.subr.bf16.mxu0 %v1155_v18  ;;  %300 = vmatprep.subr.bf16.mxu1 %v1169_v25  ;;  %v1165_v27 = vld [vmem:[%s1841_s1 + $0x60] ss:$16 sps:$4 sm:$0xff]   ;;  %v1167_v28 = vld [vmem:[%s1841_s1 + $0x84] ss:$16 sps:$4 sm:$0xff]   ;;  %v1175_v29 = vld [vmem:[%s1841_s1 + $0x4c] ss:$16 sps:$4 sm:$0xff]   ;;  %v400_v25 = vpack.c.bf16 %v1402_v12, %v1402_v12 }
   0xd   : > { %v1178_v30 = vld [vmem:[%s1841_s1 + $0x48] ss:$16 sps:$4 sm:$0xff]   ;;  %v1181_v31 = vld [vmem:[%s1841_s1 + $0x6c] ss:$16 sps:$4 sm:$0xff]   ;;  %v1171_v32 = vld [vmem:[%s1841_s1 + $0x80] ss:$16 sps:$4 sm:$0xff]  }
   0xe   : > { %v1173_v33 = vld [vmem:[%s1841_s1 + $0xa4] ss:$16 sps:$4 sm:$0xff]   ;;  %v1184_v34 = vld [vmem:[%s1841_s1 + $0x68] ss:$16 sps:$4 sm:$0xff]   ;;  %v1187_v35 = vld [vmem:[%s1841_s1 + $0x8c] ss:$16 sps:$4 sm:$0xff]  }
   0xf   : > { %260 = vmatpush1.bf16.msra.mxu0 %v1157_v19  ;;  %301 = vmatpush1.bf16.msra.mxu1 %v1172_v26  ;;  %v1177_v36 = vld [vmem:[%s1841_s1 + $0xa0] ss:$16 sps:$4 sm:$0xff]   ;;  %v1179_v37 = vld [vmem:[%s1841_s1 + $0xc4] ss:$16 sps:$4 sm:$0xff]   ;;  %v1190_v38 = vld [vmem:[%s1841_s1 + $0x88] ss:$16 sps:$4 sm:$0xff]  }
  0x10   : > { %261 = vmatprep.subr.bf16.mxu0 %v1158_v20  ;;  %302 = vmatprep.subr.bf16.mxu1 %v1175_v29  ;;  %v1191_v39 = vld [vmem:[%s1841_s1 + $0xac] ss:$16 sps:$4 sm:$0xff]   ;;  %v1183_v40 = vld [vmem:[%s1841_s1 + $0xc0] ss:$16 sps:$4 sm:$0xff]   ;;  %v1185_v41 = vld [vmem:[%s1841_s1 + $0xe4] ss:$16 sps:$4 sm:$0xff]  }
  0x11   : > { %v1193_v42 = vld [vmem:[%s1841_s1 + $0xa8] ss:$16 sps:$4 sm:$0xff]   ;;  %v1194_v43 = vld [vmem:[%s1841_s1 + $0xcc] ss:$16 sps:$4 sm:$0xff]   ;;  %v1189_v44 = vld [vmem:[%s1841_s1 + $0xe0] ss:$16 sps:$4 sm:$0xff]  }
  0x12   : > { %v1196_v45 = vld [vmem:[%s1841_s1 + $0xc8] ss:$16 sps:$4 sm:$0xff]   ;;  %v1202_v46 = vld [vmem:[%s1843_s3 + $0x4] ss:$16 sps:$4 sm:$0xff]   ;;  %v1197_v47 = vld [vmem:[%s1841_s1 + $0xec] ss:$16 sps:$4 sm:$0xff]  }
  0x13   : > { %262 = vmatpush1.bf16.msra.mxu0 %v1160_v23  ;;  %303 = vmatpush1.bf16.msra.mxu1 %v1178_v30  ;;  %v1199_v49 = vld [vmem:[%s1841_s1 + $0xe8] ss:$16 sps:$4 sm:$0xff]   ;;  %v1200_v50 = vld [vmem:[%s1843_s3] ss:$16 sps:$4 sm:$0xff]   ;;  %v1208_v51 = vld [vmem:[%s1843_s3 + $0x24] ss:$16 sps:$4 sm:$0xff]  }
  0x14   : > { %263 = vmatprep.subr.bf16.mxu0 %v1161_v24  ;;  %304 = vmatprep.subr.bf16.mxu1 %v1181_v31  ;;  %v1205_v52 = vld [vmem:[%s1843_s3 + $0xc] ss:$16 sps:$4 sm:$0xff]   ;;  %v1206_v53 = vld [vmem:[%s1843_s3 + $0x20] ss:$16 sps:$4 sm:$0xff]   ;;  %v1203_v54 = vld [vmem:[%s1843_s3 + $0x8] ss:$16 sps:$4 sm:$0xff]  }
  0x15   : > { %v1214_v55 = vld [vmem:[%s1843_s3 + $0x44] ss:$16 sps:$4 sm:$0xff]   ;;  %v1211_v56 = vld [vmem:[%s1843_s3 + $0x2c] ss:$16 sps:$4 sm:$0xff]   ;;  %v1212_v57 = vld [vmem:[%s1843_s3 + $0x40] ss:$16 sps:$4 sm:$0xff]  }
  0x16   : > { %v1209_v58 = vld [vmem:[%s1843_s3 + $0x28] ss:$16 sps:$4 sm:$0xff]   ;;  %v1220_v59 = vld [vmem:[%s1843_s3 + $0x64] ss:$16 sps:$4 sm:$0xff]   ;;  %v1217_v60 = vld [vmem:[%s1843_s3 + $0x4c] ss:$16 sps:$4 sm:$0xff]  }
  0x17   : > { %264 = vmatpush1.bf16.msra.mxu0 %v1165_v27  ;;  %305 = vmatpush1.bf16.msra.mxu1 %v1184_v34  ;;  %v1218_v61 = vld [vmem:[%s1843_s3 + $0x60] ss:$16 sps:$4 sm:$0xff]   ;;  %v1215_v62 = vld [vmem:[%s1843_s3 + $0x48] ss:$16 sps:$4 sm:$0xff]   ;;  %v1226_v63 = vld [vmem:[%s1843_s3 + $0x84] ss:$16 sps:$4 sm:$0xff]  }
  0x18   : > { %265 = vmatprep.subr.bf16.mxu0 %v1167_v28  ;;  %306 = vmatprep.subr.bf16.mxu1 %v1187_v35  ;;  %v1223_v0 = vld [vmem:[%s1843_s3 + $0x6c] ss:$16 sps:$4 sm:$0xff]   ;;  %v1224_v1 = vld [vmem:[%s1843_s3 + $0x80] ss:$16 sps:$4 sm:$0xff]   ;;  %v1221_v2 = vld [vmem:[%s1843_s3 + $0x68] ss:$16 sps:$4 sm:$0xff]  }
  0x19   : > { %v1229_v3 = vld [vmem:[%s1843_s3 + $0x8c] ss:$16 sps:$4 sm:$0xff]   ;;  %v1227_v4 = vld [vmem:[%s1843_s3 + $0x88] ss:$16 sps:$4 sm:$0xff]   ;;  %v1232_v5 = vld [vmem:[%s1843_s3 + $0xa4] ss:$16 sps:$4 sm:$0xff]  }
  0x1a   : > { %v1230_v6 = vld [vmem:[%s1843_s3 + $0xa0] ss:$16 sps:$4 sm:$0xff]   ;;  %v1235_v14 = vld [vmem:[%s1843_s3 + $0xac] ss:$16 sps:$4 sm:$0xff]   ;;  %v1233_v15 = vld [vmem:[%s1843_s3 + $0xa8] ss:$16 sps:$4 sm:$0xff]  }
  0x1b   : > { %266 = vmatpush1.bf16.msra.mxu0 %v1171_v32  ;;  %307 = vmatpush1.bf16.msra.mxu1 %v1190_v38  ;;  %v1238_v16 = vld [vmem:[%s1843_s3 + $0xc4] ss:$16 sps:$4 sm:$0xff]   ;;  %v1236_v18 = vld [vmem:[%s1843_s3 + $0xc0] ss:$16 sps:$4 sm:$0xff]   ;;  %v1241_v19 = vld [vmem:[%s1843_s3 + $0xcc] ss:$16 sps:$4 sm:$0xff]  }
  0x1c   : > { %267 = vmatprep.subr.bf16.mxu0 %v1173_v33  ;;  %308 = vmatprep.subr.bf16.mxu1 %v1191_v39  ;;  %v1239_v20 = vld [vmem:[%s1843_s3 + $0xc8] ss:$16 sps:$4 sm:$0xff]   ;;  %v1244_v21 = vld [vmem:[%s1843_s3 + $0xe4] ss:$16 sps:$4 sm:$0xff]   ;;  %v1242_v22 = vld [vmem:[%s1843_s3 + $0xe0] ss:$16 sps:$4 sm:$0xff]  }
  0x1d   : > { %v1247_v23 = vld [vmem:[%s1843_s3 + $0xec] ss:$16 sps:$4 sm:$0xff]   ;;  %v1245_v24 = vld [vmem:[%s1843_s3 + $0xe8] ss:$16 sps:$4 sm:$0xff]   ;;  %v1250_v26 = vld [vmem:[%s1842_s2 + $0x4] ss:$16 sps:$4 sm:$0xff]  }
  0x1e   : > { %v1248_v27 = vld [vmem:[%s1842_s2] ss:$16 sps:$4 sm:$0xff]   ;;  %v1251_v28 = vld [vmem:[%s1842_s2 + $0x8] ss:$16 sps:$4 sm:$0xff]   ;;  %v1253_v29 = vld [vmem:[%s1842_s2 + $0xc] ss:$16 sps:$4 sm:$0xff]  }
  0x1f   : > { %268 = vmatpush1.bf16.msra.mxu0 %v1177_v36  ;;  %309 = vmatpush1.bf16.msra.mxu1 %v1193_v42  ;;  %v1256_v12 = vld [vmem:[%s1842_s2 + $0x24] ss:$16 sps:$4 sm:$0xff]   ;;  %v1259_v30 = vld [vmem:[%s1842_s2 + $0x2c] ss:$16 sps:$4 sm:$0xff]   ;;  %v1254_v31 = vld [vmem:[%s1842_s2 + $0x20] ss:$16 sps:$4 sm:$0xff]  }
  0x20   : > { %269 = vmatprep.subr.bf16.mxu0 %v1179_v37  ;;  %310 = vmatprep.subr.bf16.mxu1 %v1194_v43  ;;  %v1257_v32 = vld [vmem:[%s1842_s2 + $0x28] ss:$16 sps:$4 sm:$0xff]   ;;  %v1262_v33 = vld [vmem:[%s1842_s2 + $0x44] ss:$16 sps:$4 sm:$0xff]   ;;  %v1260_v34 = vld [vmem:[%s1842_s2 + $0x40] ss:$16 sps:$4 sm:$0xff]  }
  0x21   : > { %v1263_v35 = vld [vmem:[%s1842_s2 + $0x48] ss:$16 sps:$4 sm:$0xff]   ;;  %v1268_v36 = vld [vmem:[%s1842_s2 + $0x64] ss:$16 sps:$4 sm:$0xff]   ;;  %v1271_v37 = vld [vmem:[%s1842_s2 + $0x6c] ss:$16 sps:$4 sm:$0xff]  }
  0x22   : > { %v1266_v38 = vld [vmem:[%s1842_s2 + $0x60] ss:$16 sps:$4 sm:$0xff]   ;;  %v1269_v39 = vld [vmem:[%s1842_s2 + $0x68] ss:$16 sps:$4 sm:$0xff]   ;;  %s52_s4 = sadd.s32 1, %s1414_s4  }
  0x23   : > { %270 = vmatpush1.bf16.msra.mxu0 %v1183_v40  ;;  %311 = vmatpush1.bf16.msra.mxu1 %v1196_v45  ;;  %v1274_v40 = vld [vmem:[%s1842_s2 + $0x84] ss:$16 sps:$4 sm:$0xff]   ;;  %v1272_v42 = vld [vmem:[%s1842_s2 + $0x80] ss:$16 sps:$4 sm:$0xff]   ;;  %v1275_v43 = vld [vmem:[%s1842_s2 + $0x88] ss:$16 sps:$4 sm:$0xff]  }
  0x24   : > { %271 = vmatprep.subr.bf16.mxu0 %v1185_v41  ;;  %312 = vmatprep.subr.bf16.mxu1 %v1197_v47  ;;  %v1277_v41 = vld [vmem:[%s1842_s2 + $0x8c] ss:$16 sps:$4 sm:$0xff]   ;;  %v1280_v45 = vld [vmem:[%s1842_s2 + $0xa4] ss:$16 sps:$4 sm:$0xff]   ;;  %p49_p0 = scmp.ge.s32.totalorder %s52_s4, 16  }
  0x25   : > { %v1283_v47 = vld [vmem:[%s1842_s2 + $0xac] ss:$16 sps:$4 sm:$0xff]   ;;  %s1417_s27 = smov (%p49_p0), [#allocation2]  }
  0x26   :  { %s956_s28 = sshll.u32 (%p49_p0), %s1417_s27, 4  ;;  %s957_s28 = int_to_ptr.vmem [resolvable:$true] %s956_s28 }
  0x27   : > { %272 = vmatpush1.bf16.msra.mxu0 %v1189_v44  ;;  %313 = vmatpush1.bf16.msra.mxu1 %v1199_v49  ;;  %v1278_v44 = vld [vmem:[%s1842_s2 + $0xa0] ss:$16 sps:$4 sm:$0xff]   ;;  %v1289_v49 = vld [vmem:[%s1842_s2 + $0xcc] ss:$16 sps:$4 sm:$0xff]   ;;  %s1328_s29 = scalar_lea.vmem (%p49_p0), %s957_s28, 256  ;;  %p1333_p2 = scmp.lt.s32.totalorder (%p49_p0), %s957_s28, %s957_s28 }
  0x28   : > { %593 = vmatprep.subr.bf16.mxu0 %v1202_v46  ;;  %634 = vmatprep.subr.bf16.mxu1 %v1205_v52  ;;  %v1281_v46 = vld [vmem:[%s1842_s2 + $0xa8] ss:$16 sps:$4 sm:$0xff]   ;;  %v1292_v52 = vld [vmem:[%s1842_s2 + $0xe4] ss:$16 sps:$4 sm:$0xff]   ;;  %p1329_p1 = scmp.ne.s32.totalorder (%p49_p0), %s957_s28, %s1328_s29  ;;  %p1334_p3 = scmp.lt.s32.totalorder (%p49_p0), %s1328_s29, %s1328_s29 }
  0x2a   : > { %290 = vmatmul.mubr.bf16.vlgmr.msra.gmra.mrb[0].mxu0 %v64_v48  ;;  %331 = vmatmul.mubr.bf16.vlgmr.msra.gmra.mrb[0].mxu1 %v64_v48  ;;  %v1286_v48 = vld [vmem:[%s1842_s2 + $0xc4] ss:$16 sps:$4 sm:$0xff]   ;;  %p1335_p4 = por (%p49_p0), %p1334_p3, %p1333_p2 }
  0x2b   : > { %594 = vmatpush1.bf16.msra.mxu0 %v1200_v50  ;;  %625 = vmatprep.mubr.bf16.mxu0 %v1416_v17  ;;  %v1284_v50 = vld [vmem:[%s1842_s2 + $0xc0] ss:$16 sps:$4 sm:$0xff]  }
  0x2c   : > { %595 = vmatprep.subr.bf16.mxu0 %v1208_v51  ;;  %635 = vmatpush1.bf16.msra.mxu1 %v1203_v54  ;;  %v1287_v51 = vld [vmem:[%s1842_s2 + $0xc8] ss:$16 sps:$4 sm:$0xff]   ;;  %v1290_v54 = vld [vmem:[%s1842_s2 + $0xe0] ss:$16 sps:$4 sm:$0xff]   ;;  %p1336_p5 = pnand (%p49_p0), %p1335_p4, %p1329_p1 }
  0x2d   : > { %636 = vmatprep.subr.bf16.mxu1 %v1211_v56  ;;  %666 = vmatprep.mubr.bf16.mxu1 %v1416_v17  ;;  %v60_v56 = vld [vmem:[%s59_s26] sm:$0xff] }
  0x2f   : > { %596 = vmatpush1.bf16.msra.mxu0 %v1206_v53  ;;  %v1295_v53 = vld [vmem:[%s1842_s2 + $0xec] ss:$16 sps:$4 sm:$0xff]  }
  0x30   : > { %597 = vmatprep.subr.bf16.mxu0 %v1214_v55  ;;  %637 = vmatpush1.bf16.msra.mxu1 %v1209_v58  ;;  %v1293_v55 = vld [vmem:[%s1842_s2 + $0xe8] ss:$16 sps:$4 sm:$0xff]  }
  0x31   : > { %638 = vmatprep.subr.bf16.mxu1 %v1217_v60 }
  0x33   : > { %598 = vmatpush1.bf16.msra.mxu0 %v1212_v57  ;;  %v61_v57 = vld [vmem:[%s59_s26 + $0x8] sm:$0xff] }
  0x34   : > { %599 = vmatprep.subr.bf16.mxu0 %v1220_v59  ;;  %639 = vmatpush1.bf16.msra.mxu1 %v1215_v62 }
  0x35   : > { %640 = vmatprep.subr.bf16.mxu1 %v1223_v0 }
  0x37   : > { %600 = vmatpush1.bf16.msra.mxu0 %v1218_v61 }
  0x38   : > { %601 = vmatprep.subr.bf16.mxu0 %v1226_v63  ;;  %641 = vmatpush1.bf16.msra.mxu1 %v1221_v2  ;;  %v63_v2 = vld [vmem:[%s59_s26 + $0x18] sm:$0xff] }
  0x39   : > { %642 = vmatprep.subr.bf16.mxu1 %v1229_v3 }
  0x3b   : > { %602 = vmatpush1.bf16.msra.mxu0 %v1224_v1 }
  0x3c   : > { %643 = vmatpush1.bf16.msra.mxu1 %v1227_v4  ;;  %603 = vmatprep.subr.bf16.mxu0 %v1232_v5 }
  0x3d   : > { %644 = vmatprep.subr.bf16.mxu1 %v1235_v14 }
  0x3f   : > { %604 = vmatpush1.bf16.msra.mxu0 %v1230_v6 }
  0x40   : > { %645 = vmatpush1.bf16.msra.mxu1 %v1233_v15  ;;  %605 = vmatprep.subr.bf16.mxu0 %v1238_v16  ;;  %v62_v15 = vld [vmem:[%s59_s26 + $0x10] sm:$0xff] }
  0x41   : > { %646 = vmatprep.subr.bf16.mxu1 %v1241_v19 }
  0x43   : > { %606 = vmatpush1.bf16.msra.mxu0 %v1236_v18 }
  0x44   : > { %647 = vmatpush1.bf16.msra.mxu1 %v1239_v20  ;;  %607 = vmatprep.subr.bf16.mxu0 %v1244_v21 }
  0x45   : > { %648 = vmatprep.subr.bf16.mxu1 %v1247_v23 }
  0x47   : > { %608 = vmatpush1.bf16.msra.mxu0 %v1242_v22 }
  0x48   : > { %649 = vmatpush1.bf16.msra.mxu1 %v1245_v24  ;;  %835 = vmatprep.subr.bf16.mxu0 %v1250_v26 }
  0x49   : > { %876 = vmatprep.subr.bf16.mxu1 %v1253_v29 }
  0x4a   : > { %626 = vmatmul.mubr.bf16.vlgmr.msra.gmra.mrb[4].mxu0 %v400_v25 }
  0x4b   : > { %867 = vmatprep.mubr.bf16.mxu0 %v1416_v17  ;;  %667 = vmatmul.mubr.bf16.vlgmr.msra.gmra.mrb[4].mxu1 %v400_v25 }
  0x4c   : > { %836 = vmatpush1.bf16.msra.mxu0 %v1248_v27  ;;  %877 = vmatpush1.bf16.msra.mxu1 %v1251_v28 }
  0x4d   : > { %908 = vmatprep.mubr.bf16.mxu1 %v1416_v17  ;;  %837 = vmatprep.subr.bf16.mxu0 %v1256_v12  ;;  %v1265_v17 = vld [vmem:[%s1842_s2 + $0x4c] ss:$16 sps:$4 sm:$0xff]  }
  0x4e   : > { %878 = vmatprep.subr.bf16.mxu1 %v1259_v30 }
  0x50   : > { %838 = vmatpush1.bf16.msra.mxu0 %v1254_v31  ;;  %879 = vmatpush1.bf16.msra.mxu1 %v1257_v32 }
  0x51   : > { %839 = vmatprep.subr.bf16.mxu0 %v1262_v33  ;;  %880 = vmatprep.subr.bf16.mxu1 %v1265_v17 }
  0x54   : > { %840 = vmatpush1.bf16.msra.mxu0 %v1260_v34  ;;  %881 = vmatpush1.bf16.msra.mxu1 %v1263_v35 }
  0x55   : > { %841 = vmatprep.subr.bf16.mxu0 %v1268_v36  ;;  %882 = vmatprep.subr.bf16.mxu1 %v1271_v37 }
  0x58   : > { %842 = vmatpush1.bf16.msra.mxu0 %v1266_v38  ;;  %883 = vmatpush1.bf16.msra.mxu1 %v1269_v39 }
  0x59   : > { %843 = vmatprep.subr.bf16.mxu0 %v1274_v40  ;;  %884 = vmatprep.subr.bf16.mxu1 %v1277_v41 }
  0x5c   : > { %844 = vmatpush1.bf16.msra.mxu0 %v1272_v42  ;;  %885 = vmatpush1.bf16.msra.mxu1 %v1275_v43 }
  0x5d   : > { %845 = vmatprep.subr.bf16.mxu0 %v1280_v45  ;;  %886 = vmatprep.subr.bf16.mxu1 %v1283_v47 }
  0x60   : > { %846 = vmatpush1.bf16.msra.mxu0 %v1278_v44  ;;  %887 = vmatpush1.bf16.msra.mxu1 %v1281_v46 }
  0x61   : > { %847 = vmatprep.subr.bf16.mxu0 %v1286_v48  ;;  %888 = vmatprep.subr.bf16.mxu1 %v1289_v49 }
  0x64   : > { %848 = vmatpush1.bf16.msra.mxu0 %v1284_v50  ;;  %889 = vmatpush1.bf16.msra.mxu1 %v1287_v51 }
  0x65   : > { %849 = vmatprep.subr.bf16.mxu0 %v1292_v52  ;;  %890 = vmatprep.subr.bf16.mxu1 %v1295_v53 }
  0x68   : > { %850 = vmatpush1.bf16.msra.mxu0 %v1290_v54  ;;  %891 = vmatpush1.bf16.msra.mxu1 %v1293_v55 }
  0xfd   : > { %v291_v58 = vpop.f32.mrb[0].mxu0  ;;  %v332_v3 = vpop.f32.mrb[0].mxu1 }
  0xfe   : > { %v339_v59 = vadd.f32 %v291_v58, %v60_v56  ;;  %v293_v60 = vpop.f32.mrb[1].mxu0  ;;  %v334_v4 = vpop.f32.mrb[1].mxu1  ;;  %v341_v18 = vadd.f32 %v332_v3, %v62_v15 }
  0xff   : > { %v340_v61 = vadd.f32 %v293_v60, %v61_v57  ;;  %v295_v62 = vpop.f32.mrb[2].mxu0  ;;  %v342_v5 = vadd.f32 %v334_v4, %v63_v2  ;;  %v336_v6 = vpop.f32.mrb[2].mxu1 }
 0x100   : > { %v1036_v63 = vmul.f32 -1.442695, %v339_v59  ;;  %v296_v0 = vpop.f32.mrb[3].mxu0  ;;  %v337_v14 = vpop.f32.mrb[3].mxu1 }
 0x101   : > { %v1037_v1 = vmul.f32 -1.442695, %v340_v61  ;;  %v1038_v16 = vmul.f32 -1.442695, %v342_v5 }
 0x102   : > { %1296 = vpow2.f32 %v1036_v63 }
 0x103   : > { %1298 = vpow2.f32 %v1037_v1 }
 0x104   : > { %1300 = vpow2.f32 %v1038_v16 }
 0x105   : > { %1302 = vtanh.f32 %v341_v18 }
 0x10c   : > { %v1297_v19 = vpop.eup %1296 }
 0x10d   : > { %v1299_v20 = vpop.eup %1298  ;;  %v346_v21 = vadd.f32 1.0, %v1297_v19 }
 0x10e   : > { %v352_v22 = vadd.f32 1.0, %v1299_v20  ;;  %v1301_v23 = vpop.eup %1300 }
 0x10f   : > { %1304 = vrcp.f32 %v346_v21  ;;  %v1303_v24 = vpop.eup %1302  ;;  %v359_v26 = vadd.f32 1.0, %v1301_v23 }
 0x110   : > { %1306 = vrcp.f32 %v352_v22 }
 0x111   : > { %1308 = vrcp.f32 %v359_v26 }
 0x119   : > { %v1305_v25 = vpop.eup %1304 }
 0x11a   : > { %v1307_v27 = vpop.eup %1306  ;;  %v363_v28 = vmul.f32 %v1305_v25, %v1303_v24 }
 0x11b   : > { %v362_v29 = vmul.f32 %v1406_v13, %v1307_v27  ;;  %v1309_v12 = vpop.eup %1308 }
 0x11d   : > { %v1795_v13 = vadd.f32 %v363_v28, %v362_v29   ;;  %v627_v17 = vpop.f32.mrb[4].mxu0 }
 0x11e   : > { %v629_v34 = vpop.f32.mrb[5].mxu0  ;;  %v668_v36 = vpop.f32.mrb[4].mxu1 }
 0x11f   : > { %v1847_v30 = vmov %v1795_v13  ;;  %v631_v35 = vpop.f32.mrb[6].mxu0  ;;  %v670_v38 = vpop.f32.mrb[5].mxu1 }
 0x120   : > { %1310 = vtanh.f32 %v1847_v30  ;;  %v632_v37 = vpop.f32.mrb[7].mxu0  ;;  %v672_v39 = vpop.f32.mrb[6].mxu1  ;;  %948 = vst [vmem:[#allocation4] sm:$0xff] (%p49_p0), %v1847_v30 }
 0x121   : > { %v673_v40 = vpop.f32.mrb[7].mxu1 }
 0x12a   : > { %v1311_v31 = vpop.eup %1310 }
 0x12b   : > { %v366_v32 = vmul.f32 %v1311_v31, %v1309_v12  }
 0x12d   : > { %v367_v33 = vpack.c.bf16 %v366_v32, %v366_v32  ;;  %945 = vst [vmem:[#allocation2] sm:$0xff] (%p49_p0), %v366_v32 }
 0x12f   : > { %868 = vmatmul.mubr.bf16.vlgmr.msra.gmra.mrb[8].mxu0 %v367_v33  ;;  %909 = vmatmul.mubr.bf16.vlgmr.msra.gmra.mrb[8].mxu1 %v367_v33 }
 0x202   : > { %v869_v41 = vpop.f32.mrb[8].mxu0  ;;  %v910_v42 = vpop.f32.mrb[8].mxu1 }
 0x203   : > { %v870_v13 = vadd.f32 %v869_v41, %v627_v17  ;;  %v911_v43 = vadd.f32 %v910_v42, %v668_v36  ;;  %v871_v44 = vpop.f32.mrb[9].mxu0  ;;  %v912_v45 = vpop.f32.mrb[9].mxu1 }
 0x204   : > { %v872_v46 = vadd.f32 %v871_v44, %v629_v34  ;;  %v913_v47 = vadd.f32 %v912_v45, %v670_v38  ;;  %v873_v48 = vpop.f32.mrb[10].mxu0  ;;  %v914_v49 = vpop.f32.mrb[10].mxu1 }
 0x205   : > { %v917_v50 = vadd.f32 %v870_v13, %v1459_v7  ;;  %v874_v51 = vpop.f32.mrb[11].mxu0  ;;  %v915_v52 = vpop.f32.mrb[11].mxu1  ;;  %v919_v58 = vadd.f32 %v911_v43, %v1463_v9  ;;  %v1850_v13 = vmov %v1847_v30 }
 0x206   : > { %v918_v53 = vadd.f32 %v872_v46, %v1461_v8  ;;  %v920_v56 = vadd.f32 %v913_v47, %v1465_v10 }
 0x207   : > { %v1103_v54 = vmul.f32 -1.442695, %v917_v50 }
 0x208   : > { %v1104_v55 = vmul.f32 -1.442695, %v918_v53  ;;  %v1105_v57 = vmul.f32 -1.442695, %v920_v56 }
 0x209   : > { %1312 = vpow2.f32 %v1103_v54 }
 0x20a   : > { %1314 = vpow2.f32 %v1104_v55 }
 0x20b   : > { %1316 = vpow2.f32 %v1105_v57 }
 0x20c   : > { %1318 = vtanh.f32 %v919_v58 }
 0x213   : > { %v1313_v59 = vpop.eup %1312 }
 0x214   : > { %v1315_v60 = vpop.eup %1314  ;;  %v924_v61 = vadd.f32 1.0, %v1313_v59 }
 0x215   : > { %v930_v62 = vadd.f32 1.0, %v1315_v60  ;;  %v1317_v63 = vpop.eup %1316 }
 0x216   : > { %1320 = vrcp.f32 %v924_v61  ;;  %v1319_v0 = vpop.eup %1318  ;;  %v937_v4 = vadd.f32 1.0, %v1317_v63 }
 0x217   : > { %1322 = vrcp.f32 %v930_v62 }
 0x218   : > { %1324 = vrcp.f32 %v937_v4 }
 0x220   : > { %v1321_v1 = vpop.eup %1320 }
 0x221   : > { %v1323_v2 = vpop.eup %1322  ;;  %v941_v3 = vmul.f32 %v1321_v1, %v1319_v0 }
 0x222   : > { %v940_v5 = vmul.f32 %v1398_v11, %v1323_v2  ;;  %v1325_v14 = vpop.eup %1324 }
 0x224   : > { %v942_v6 = vadd.f32 %v941_v3, %v940_v5  }
 0x226   : > { %1326 = vtanh.f32 %v942_v6  ;;  %v1848_v11 = vmov %v942_v6  ;;  %950 = vst [vmem:[#allocation4 + $0x8] sm:$0xff] (%p49_p0), %v942_v6 }
 0x22d   :  { %51 = sbr.rel (!%p49_p0) target bundleno = 8 (0x8), region = 58 }
 0x230   : > { %v1327_v15 = vpop.eup %1326 }
 0x231   : > { %v944_v16 = vmul.f32 %v1327_v15, %v1325_v14   ;;  %v1851_v14 = vmov %v366_v32 }
 0x233   : > { %v1849_v12 = vmov %v944_v16  ;;  %947 = vst [vmem:[#allocation2 + $0x8] sm:$0xff] (%p49_p0), %v944_v16 }
 0x234   :  { %1339 = shalt.err (!%p1336_p5)
}
 0x235   :  { %s1340_s4 = scalar_lea.hbm %s1845_s5, 256 }
 0x236   :  { %p1341_p6 = scmp.ne.s32.totalorder %s1845_s5, %s1340_s4  ;;  %p1344_p7 = scmp.lt.u32.totalorder %s1340_s4, %s1845_s5 }
 0x238   :  { %p1346_p8 = pnand %p1344_p7, %p1341_p6 }
 0x23a   :  { %1349 = shalt.err (!%p1346_p8)
}
 0x23b   :  { %s1418_s3 = smov 128   ;;  %s1419_s9 = smov 8  }
 0x23c   :  { %962 = dma.vmem_to_hbm [thread:$0]  %s957_s28, 256, %s1845_s5, [#allocation3], %s1418_s3, %s1418_s3, %s1419_s9  }
 0x23d   :  { %s1420_s12 = smov [#allocation4]  }
 0x23e   :  { %s968_s13 = sshll.u32 %s1420_s12, 4  ;;  %s969_s13 = int_to_ptr.vmem [resolvable:$true] %s968_s13 }
 0x23f   :  { %s1350_s14 = scalar_lea.vmem %s969_s13, 256  ;;  %p1355_p10 = scmp.lt.s32.totalorder %s969_s13, %s969_s13 }
 0x240   :  { %p1351_p9 = scmp.ne.s32.totalorder %s969_s13, %s1350_s14  ;;  %p1356_p11 = scmp.lt.s32.totalorder %s1350_s14, %s1350_s14 }
 0x242   :  { %p1357_p12 = por %p1356_p11, %p1355_p10 }
 0x244   :  { %p1358_p13 = pnand %p1357_p12, %p1351_p9 }
 0x246   :  { %1361 = shalt.err (!%p1358_p13)
}
 0x247   :  { %s1362_s17 = scalar_lea.hbm %s1846_s6, 256 }
 0x248   :  { %p1363_p0 = scmp.ne.s32.totalorder %s1846_s6, %s1362_s17  ;;  %p1366_p1 = scmp.lt.u32.totalorder %s1362_s17, %s1846_s6 }
 0x24a   :  { %p1368_p2 = pnand %p1366_p1, %p1363_p0 }
 0x24c   :  { %1371 = shalt.err (!%p1368_p2)
}
 0x24d   :  { %974 = dma.vmem_to_hbm [thread:$0]  %s969_s13, 256, %s1846_s6, [#allocation5], %s1418_s3, %s1418_s3, %s1419_s9  }
 0x24e   :  { %1392 = dma.done.wait [#allocation3], 256  }
 0x24f   :  { %1393 = vsyncadd [#allocation3], 4294967040 }
 0x250   :  { %1394 = dma.done.wait [#allocation5], 256  }
 0x251   :  { %1395 = vsyncadd [#allocation5], 4294967040 }
 0x252   :  { %981 = vsyncpa [#allocation3], 1 }
 0x253   :  { %982 = vsyncpa [#allocation5], 1 }

// kernel: encoder_forward.2
= control target key start
LH: loop header
LB: loop body
LE: loop exit
PB: predicated region body
PF: predicated region fallthrough
CT: control target
= control target key end

     0   :  { %v571_v3 = vmov 0.0   ;;  %s1131_s1 = inlined_call_operand.vmem [shape: f32[128,512], index: 1, kind: input, shape index: {}]   ;;  %s1132_s0 = inlined_call_operand.vmem [shape: f32[128,128], index: 0, kind: input, shape index: {}]   ;;  %s1133_s2 = inlined_call_operand.vmem [shape: f32[1,512], index: 2, kind: input, shape index: {}]   ;;  %s1134_s3 = inlined_call_operand.vmem [shape: f32[128,512], index: 3, kind: output, shape index: {}]  }
   0x1   :  { %v31_v0 = vld [vmem:[%s1131_s1 + $0x8] sm:$0xff]  ;;  %v33_v2 = vld [vmem:[%s1131_s1 + $0x18] sm:$0xff]  ;;  %180 = vmatprep.mubr.f32.mxu0 %v571_v3  ;;  %341 = vmatprep.mubr.f32.mxu1 %v571_v3  ;;  %v30_v6 = vld [vmem:[%s1131_s1] sm:$0xff] }
   0x2   :  { %v35_v1 = vld [vmem:[%s1131_s1 + $0x28] sm:$0xff]  ;;  %v37_v5 = vld [vmem:[%s1131_s1 + $0x38] sm:$0xff]  ;;  %v34_v7 = vld [vmem:[%s1131_s1 + $0x20] sm:$0xff] }
   0x3   :  { %v506_v4 = vpack.c.bf16 %v35_v1, %v31_v0  ;;  %v538_v8 = vpack.c.bf16 %v37_v5, %v33_v2  ;;  %v508_v9 = vpack.c.bf16 %v34_v7, %v30_v6  ;;  %v32_v10 = vld [vmem:[%s1131_s1 + $0x10] sm:$0xff]  ;;  %v39_v12 = vld [vmem:[%s1131_s1 + $0x48] sm:$0xff]  ;;  %v41_v15 = vld [vmem:[%s1131_s1 + $0x58] sm:$0xff] }
   0x4   :  { %v36_v11 = vld [vmem:[%s1131_s1 + $0x30] sm:$0xff]  ;;  %v43_v14 = vld [vmem:[%s1131_s1 + $0x68] sm:$0xff]  ;;  %v45_v16 = vld [vmem:[%s1131_s1 + $0x78] sm:$0xff] }
   0x5   :  { %507 = vmatprep.subr.bf16.mxu0 %v506_v4  ;;  %v540_v13 = vpack.c.bf16 %v36_v11, %v32_v10  ;;  %539 = vmatprep.subr.bf16.mxu1 %v538_v8  ;;  %v510_v17 = vpack.c.bf16 %v43_v14, %v39_v12  ;;  %v542_v18 = vpack.c.bf16 %v45_v16, %v41_v15  ;;  %v38_v19 = vld [vmem:[%s1131_s1 + $0x40] sm:$0xff]  ;;  %v40_v21 = vld [vmem:[%s1131_s1 + $0x50] sm:$0xff]  ;;  %v47_v24 = vld [vmem:[%s1131_s1 + $0x88] sm:$0xff] }
   0x6   :  { %509 = vmatpush1.bf16.msra.mxu0 %v508_v9  ;;  %v42_v20 = vld [vmem:[%s1131_s1 + $0x60] sm:$0xff]  ;;  %v44_v23 = vld [vmem:[%s1131_s1 + $0x70] sm:$0xff]  ;;  %v51_v25 = vld [vmem:[%s1131_s1 + $0xa8] sm:$0xff] }
   0x7   :  { %541 = vmatpush1.bf16.msra.mxu1 %v540_v13  ;;  %v512_v22 = vpack.c.bf16 %v42_v20, %v38_v19  ;;  %511 = vmatprep.subr.bf16.mxu0 %v510_v17  ;;  %v544_v26 = vpack.c.bf16 %v44_v23, %v40_v21  ;;  %v514_v27 = vpack.c.bf16 %v51_v25, %v47_v24  ;;  %v49_v28 = vld [vmem:[%s1131_s1 + $0x98] sm:$0xff]  ;;  %v46_v30 = vld [vmem:[%s1131_s1 + $0x80] sm:$0xff]  ;;  %v48_v33 = vld [vmem:[%s1131_s1 + $0x90] sm:$0xff] }
   0x8   :  { %543 = vmatprep.subr.bf16.mxu1 %v542_v18  ;;  %v53_v29 = vld [vmem:[%s1131_s1 + $0xb8] sm:$0xff]  ;;  %v50_v32 = vld [vmem:[%s1131_s1 + $0xa0] sm:$0xff]  ;;  %v52_v34 = vld [vmem:[%s1131_s1 + $0xb0] sm:$0xff] }
   0x9   :  { %v546_v31 = vpack.c.bf16 %v53_v29, %v49_v28  ;;  %v516_v35 = vpack.c.bf16 %v50_v32, %v46_v30  ;;  %v55_v36 = vld [vmem:[%s1131_s1 + $0xc8] sm:$0xff]  ;;  %v57_v38 = vld [vmem:[%s1131_s1 + $0xd8] sm:$0xff]  ;;  %v548_v39 = vpack.c.bf16 %v52_v34, %v48_v33  ;;  %v54_v42 = vld [vmem:[%s1131_s1 + $0xc0] sm:$0xff] }
   0xa   :  { %513 = vmatpush1.bf16.msra.mxu0 %v512_v22  ;;  %v59_v37 = vld [vmem:[%s1131_s1 + $0xe8] sm:$0xff]  ;;  %v61_v41 = vld [vmem:[%s1131_s1 + $0xf8] sm:$0xff]  ;;  %v58_v43 = vld [vmem:[%s1131_s1 + $0xe0] sm:$0xff] }
   0xb   :  { %545 = vmatpush1.bf16.msra.mxu1 %v544_v26  ;;  %515 = vmatprep.subr.bf16.mxu0 %v514_v27  ;;  %v518_v40 = vpack.c.bf16 %v59_v37, %v55_v36  ;;  %v550_v44 = vpack.c.bf16 %v61_v41, %v57_v38  ;;  %v56_v45 = vld [vmem:[%s1131_s1 + $0xd0] sm:$0xff]  ;;  %v63_v47 = vld [vmem:[%s1131_s1 + $0x108] sm:$0xff]  ;;  %v65_v49 = vld [vmem:[%s1131_s1 + $0x118] sm:$0xff]  ;;  %v520_v51 = vpack.c.bf16 %v58_v43, %v54_v42 }
   0xc   :  { %547 = vmatprep.subr.bf16.mxu1 %v546_v31  ;;  %v60_v46 = vld [vmem:[%s1131_s1 + $0xf0] sm:$0xff]  ;;  %v67_v48 = vld [vmem:[%s1131_s1 + $0x128] sm:$0xff]  ;;  %v69_v50 = vld [vmem:[%s1131_s1 + $0x138] sm:$0xff] }
   0xd   :  { %v552_v52 = vpack.c.bf16 %v60_v46, %v56_v45  ;;  %v522_v53 = vpack.c.bf16 %v67_v48, %v63_v47  ;;  %v62_v54 = vld [vmem:[%s1131_s1 + $0x100] sm:$0xff]  ;;  %v64_v56 = vld [vmem:[%s1131_s1 + $0x110] sm:$0xff]  ;;  %v554_v57 = vpack.c.bf16 %v69_v50, %v65_v49  ;;  %v71_v59 = vld [vmem:[%s1131_s1 + $0x148] sm:$0xff]  ;;  %v96_v50 = vlaneseq }
   0xe   :  { %517 = vmatpush1.bf16.msra.mxu0 %v516_v35  ;;  %v66_v55 = vld [vmem:[%s1131_s1 + $0x120] sm:$0xff]  ;;  %v68_v58 = vld [vmem:[%s1131_s1 + $0x130] sm:$0xff]  ;;  %v75_v60 = vld [vmem:[%s1131_s1 + $0x168] sm:$0xff] }
   0xf   :  { %549 = vmatpush1.bf16.msra.mxu1 %v548_v39  ;;  %519 = vmatprep.subr.bf16.mxu0 %v518_v40  ;;  %v73_v61 = vld [vmem:[%s1131_s1 + $0x158] sm:$0xff]  ;;  %v524_v63 = vpack.c.bf16 %v66_v55, %v62_v54  ;;  %v556_v0 = vpack.c.bf16 %v68_v58, %v64_v56  ;;  %v526_v1 = vpack.c.bf16 %v75_v60, %v71_v59  ;;  %v70_v2 = vld [vmem:[%s1131_s1 + $0x140] sm:$0xff]  ;;  %v72_v5 = vld [vmem:[%s1131_s1 + $0x150] sm:$0xff] }
  0x10   :  { %551 = vmatprep.subr.bf16.mxu1 %v550_v44  ;;  %v77_v62 = vld [vmem:[%s1131_s1 + $0x178] sm:$0xff]  ;;  %v74_v4 = vld [vmem:[%s1131_s1 + $0x160] sm:$0xff]  ;;  %v76_v7 = vld [vmem:[%s1131_s1 + $0x170] sm:$0xff] }
  0x11   :  { %v558_v6 = vpack.c.bf16 %v77_v62, %v73_v61  ;;  %v79_v8 = vld [vmem:[%s1131_s1 + $0x188] sm:$0xff]  ;;  %v81_v10 = vld [vmem:[%s1131_s1 + $0x198] sm:$0xff]  ;;  %v528_v12 = vpack.c.bf16 %v74_v4, %v70_v2  ;;  %v560_v13 = vpack.c.bf16 %v76_v7, %v72_v5  ;;  %v78_v15 = vld [vmem:[%s1131_s1 + $0x180] sm:$0xff] }
  0x12   :  { %521 = vmatpush1.bf16.msra.mxu0 %v520_v51  ;;  %v83_v9 = vld [vmem:[%s1131_s1 + $0x1a8] sm:$0xff]  ;;  %v85_v11 = vld [vmem:[%s1131_s1 + $0x1b8] sm:$0xff]  ;;  %v82_v16 = vld [vmem:[%s1131_s1 + $0x1a0] sm:$0xff]  ;;  %v97_v51 = vshrl.u32 %v96_v50, 7 }
  0x13   :  { %553 = vmatpush1.bf16.msra.mxu1 %v552_v52  ;;  %523 = vmatprep.subr.bf16.mxu0 %v522_v53  ;;  %v530_v14 = vpack.c.bf16 %v83_v9, %v79_v8  ;;  %v80_v17 = vld [vmem:[%s1131_s1 + $0x190] sm:$0xff]  ;;  %v562_v18 = vpack.c.bf16 %v85_v11, %v81_v10  ;;  %v87_v20 = vld [vmem:[%s1131_s1 + $0x1c8] sm:$0xff]  ;;  %v89_v22 = vld [vmem:[%s1131_s1 + $0x1d8] sm:$0xff]  ;;  %v532_v24 = vpack.c.bf16 %v82_v16, %v78_v15 }
  0x14   :  { %555 = vmatprep.subr.bf16.mxu1 %v554_v57  ;;  %v84_v19 = vld [vmem:[%s1131_s1 + $0x1b0] sm:$0xff]  ;;  %v91_v21 = vld [vmem:[%s1131_s1 + $0x1e8] sm:$0xff]  ;;  %v93_v23 = vld [vmem:[%s1131_s1 + $0x1f8] sm:$0xff]  ;;  %v98_v52 = vsub.s32 0, %v97_v51  ;;  %v106_v54 = vsub.s32 2, %v97_v51  ;;  %v102_v55 = vsub.s32 1, %v97_v51 }
  0x15   :  { %v564_v25 = vpack.c.bf16 %v84_v19, %v80_v17  ;;  %v534_v26 = vpack.c.bf16 %v91_v21, %v87_v20  ;;  %v86_v27 = vld [vmem:[%s1131_s1 + $0x1c0] sm:$0xff]  ;;  %v566_v29 = vpack.c.bf16 %v93_v23, %v89_v22  ;;  %v88_v30 = vld [vmem:[%s1131_s1 + $0x1d0] sm:$0xff]  ;;  %v15_v35 = vld [vmem:[%s1132_s0 + $0x8] sm:$0xff]  ;;  %v110_v56 = vsub.s32 3, %v97_v51 }
  0x16   :  { %525 = vmatpush1.bf16.msra.mxu0 %v524_v63  ;;  %v90_v28 = vld [vmem:[%s1131_s1 + $0x1e0] sm:$0xff]  ;;  %v92_v31 = vld [vmem:[%s1131_s1 + $0x1f0] sm:$0xff]  ;;  %v17_v37 = vld [vmem:[%s1132_s0 + $0x18] sm:$0xff] }
  0x17   :  { %557 = vmatpush1.bf16.msra.mxu1 %v556_v0  ;;  %527 = vmatprep.subr.bf16.mxu0 %v526_v1  ;;  %v536_v32 = vpack.c.bf16 %v90_v28, %v86_v27  ;;  %v568_v33 = vpack.c.bf16 %v92_v31, %v88_v30  ;;  %v14_v34 = vld [vmem:[%s1132_s0] sm:$0xff]  ;;  %v16_v36 = vld [vmem:[%s1132_s0 + $0x10] sm:$0xff]  ;;  %v19_v39 = vld [vmem:[%s1132_s0 + $0x28] sm:$0xff] }
  0x18   :  { %559 = vmatprep.subr.bf16.mxu1 %v558_v6  ;;  %v18_v38 = vld [vmem:[%s1132_s0 + $0x20] sm:$0xff]  ;;  %v20_v40 = vld [vmem:[%s1132_s0 + $0x30] sm:$0xff]  ;;  %v21_v41 = vld [vmem:[%s1132_s0 + $0x38] sm:$0xff] }
  0x19   :  { %v22_v42 = vld [vmem:[%s1132_s0 + $0x40] sm:$0xff]  ;;  %v23_v43 = vld [vmem:[%s1132_s0 + $0x48] sm:$0xff]  ;;  %v24_v44 = vld [vmem:[%s1132_s0 + $0x50] sm:$0xff] }
  0x1a   :  { %529 = vmatpush1.bf16.msra.mxu0 %v528_v12  ;;  %v25_v45 = vld [vmem:[%s1132_s0 + $0x58] sm:$0xff]  ;;  %v26_v46 = vld [vmem:[%s1132_s0 + $0x60] sm:$0xff]  ;;  %v27_v47 = vld [vmem:[%s1132_s0 + $0x68] sm:$0xff] }
  0x1b   :  { %561 = vmatpush1.bf16.msra.mxu1 %v560_v13  ;;  %531 = vmatprep.subr.bf16.mxu0 %v530_v14  ;;  %v28_v48 = vld [vmem:[%s1132_s0 + $0x70] sm:$0xff]  ;;  %v29_v49 = vld [vmem:[%s1132_s0 + $0x78] sm:$0xff]  ;;  %v94_v53 = vld [vmem:[%s1133_s2] sm:$0xf] }
  0x1c   :  { %563 = vmatprep.subr.bf16.mxu1 %v562_v18  ;;  %v867_v57 = vrot.slane %v94_v53, %v98_v52  ;;  %v869_v58 = vrot.slane %v94_v53, %v106_v54  ;;  %v871_v59 = vrot.slane %v94_v53, %v102_v55  ;;  %v873_v60 = vrot.slane %v94_v53, %v110_v56 }
  0x1e   :  { %533 = vmatpush1.bf16.msra.mxu0 %v532_v24 }
  0x1f   :  { %565 = vmatpush1.bf16.msra.mxu1 %v564_v25  ;;  %535 = vmatprep.subr.bf16.mxu0 %v534_v26 }
  0x20   :  { %567 = vmatprep.subr.bf16.mxu1 %v566_v29 }
  0x22   :  { %537 = vmatpush1.bf16.msra.mxu0 %v536_v32 }
  0x23   :  { %569 = vmatpush1.bf16.msra.mxu1 %v568_v33 }
  0x25   :  { %181 = vmatmul.mubr.f32.vlgmr.msra.gmra.mrb[0].mxu0 %v14_v34 }
  0x26   :  { %342 = vmatmul.mubr.f32.vlgmr.msra.gmra.mrb[0].mxu1 %v14_v34  ;;  %186 = vmatprep.mubr.f32.mxu0 %v571_v3 }
  0x27   :  { %347 = vmatprep.mubr.f32.mxu1 %v571_v3 }
  0x29   :  { %187 = vmatmul.mubr.f32.gmra.mrb[2].mxu0 %v15_v35 }
  0x2a   :  { %348 = vmatmul.mubr.f32.gmra.mrb[2].mxu1 %v15_v35  ;;  %192 = vmatprep.mubr.f32.mxu0 %v571_v3 }
  0x2b   :  { %353 = vmatprep.mubr.f32.mxu1 %v571_v3 }
  0x2d   :  { %193 = vmatmul.mubr.f32.gmra.mrb[4].mxu0 %v16_v36 }
  0x2e   :  { %354 = vmatmul.mubr.f32.gmra.mrb[4].mxu1 %v16_v36  ;;  %198 = vmatprep.mubr.f32.mxu0 %v571_v3 }
  0x2f   :  { %359 = vmatprep.mubr.f32.mxu1 %v571_v3 }
  0x31   :  { %199 = vmatmul.mubr.f32.gmra.mrb[6].mxu0 %v17_v37 }
  0x32   :  { %360 = vmatmul.mubr.f32.gmra.mrb[6].mxu1 %v17_v37  ;;  %204 = vmatprep.mubr.f32.mxu0 %v571_v3 }
  0x33   :  { %365 = vmatprep.mubr.f32.mxu1 %v571_v3 }
  0x35   :  { %205 = vmatmul.mubr.f32.gmra.mrb[8].mxu0 %v18_v38 }
  0x36   :  { %366 = vmatmul.mubr.f32.gmra.mrb[8].mxu1 %v18_v38  ;;  %210 = vmatprep.mubr.f32.mxu0 %v571_v3 }
  0x37   :  { %371 = vmatprep.mubr.f32.mxu1 %v571_v3 }
  0x39   :  { %211 = vmatmul.mubr.f32.gmra.mrb[10].mxu0 %v19_v39 }
  0x3a   :  { %372 = vmatmul.mubr.f32.gmra.mrb[10].mxu1 %v19_v39  ;;  %216 = vmatprep.mubr.f32.mxu0 %v571_v3 }
  0x3b   :  { %377 = vmatprep.mubr.f32.mxu1 %v571_v3 }
  0x3d   :  { %217 = vmatmul.mubr.f32.gmra.mrb[12].mxu0 %v20_v40 }
  0x3e   :  { %378 = vmatmul.mubr.f32.gmra.mrb[12].mxu1 %v20_v40  ;;  %222 = vmatprep.mubr.f32.mxu0 %v571_v3 }
  0x3f   :  { %383 = vmatprep.mubr.f32.mxu1 %v571_v3 }
  0x41   :  { %223 = vmatmul.mubr.f32.gmra.mrb[14].mxu0 %v21_v41 }
  0x42   :  { %384 = vmatmul.mubr.f32.gmra.mrb[14].mxu1 %v21_v41  ;;  %228 = vmatprep.mubr.f32.mxu0 %v571_v3 }
  0x43   :  { %389 = vmatprep.mubr.f32.mxu1 %v571_v3 }
  0x45   :  { %229 = vmatmul.mubr.f32.gmra.mrb[16].mxu0 %v22_v42 }
  0x46   :  { %390 = vmatmul.mubr.f32.gmra.mrb[16].mxu1 %v22_v42  ;;  %234 = vmatprep.mubr.f32.mxu0 %v571_v3 }
  0x47   :  { %395 = vmatprep.mubr.f32.mxu1 %v571_v3 }
  0x49   :  { %235 = vmatmul.mubr.f32.gmra.mrb[18].mxu0 %v23_v43 }
  0x4a   :  { %396 = vmatmul.mubr.f32.gmra.mrb[18].mxu1 %v23_v43  ;;  %240 = vmatprep.mubr.f32.mxu0 %v571_v3 }
  0x4b   :  { %401 = vmatprep.mubr.f32.mxu1 %v571_v3 }
  0x4d   :  { %241 = vmatmul.mubr.f32.gmra.mrb[20].mxu0 %v24_v44 }
  0x4e   :  { %402 = vmatmul.mubr.f32.gmra.mrb[20].mxu1 %v24_v44  ;;  %246 = vmatprep.mubr.f32.mxu0 %v571_v3 }
  0x4f   :  { %407 = vmatprep.mubr.f32.mxu1 %v571_v3 }
  0x51   :  { %247 = vmatmul.mubr.f32.gmra.mrb[22].mxu0 %v25_v45 }
  0x52   :  { %408 = vmatmul.mubr.f32.gmra.mrb[22].mxu1 %v25_v45  ;;  %252 = vmatprep.mubr.f32.mxu0 %v571_v3 }
  0x53   :  { %413 = vmatprep.mubr.f32.mxu1 %v571_v3 }
  0x55   :  { %253 = vmatmul.mubr.f32.gmra.mrb[24].mxu0 %v26_v46 }
  0x56   :  { %414 = vmatmul.mubr.f32.gmra.mrb[24].mxu1 %v26_v46  ;;  %258 = vmatprep.mubr.f32.mxu0 %v571_v3 }
  0x57   :  { %419 = vmatprep.mubr.f32.mxu1 %v571_v3 }
  0x59   :  { %259 = vmatmul.mubr.f32.gmra.mrb[26].mxu0 %v27_v47 }
  0x5a   :  { %420 = vmatmul.mubr.f32.gmra.mrb[26].mxu1 %v27_v47  ;;  %264 = vmatprep.mubr.f32.mxu0 %v571_v3 }
  0x5b   :  { %425 = vmatprep.mubr.f32.mxu1 %v571_v3 }
  0x5d   :  { %265 = vmatmul.mubr.f32.gmra.mrb[28].mxu0 %v28_v48 }
  0x5e   :  { %426 = vmatmul.mubr.f32.gmra.mrb[28].mxu1 %v28_v48  ;;  %270 = vmatprep.mubr.f32.mxu0 %v571_v3 }
  0x5f   :  { %431 = vmatprep.mubr.f32.mxu1 %v571_v3 }
  0x61   :  { %271 = vmatmul.mubr.f32.gmra.mrb[30].mxu0 %v29_v49 }
  0x62   :  { %432 = vmatmul.mubr.f32.gmra.mrb[30].mxu1 %v29_v49 }
  0xf8   :  { %v182_v3 = vpop.f32.mrb[0].mxu0 }
  0xf9   :  { %v183_v61 = vadd.f32 %v182_v3, %v867_v57  ;;  %v343_v62 = vpop.f32.mrb[0].mxu1  ;;  %v184_v63 = vpop.f32.mrb[1].mxu0 }
  0xfa   :  { %v344_v0 = vadd.f32 %v343_v62, %v869_v58  ;;  %v185_v1 = vadd.f32 %v184_v63, %v871_v59  ;;  %v345_v2 = vpop.f32.mrb[1].mxu1 }
  0xfb   :  { %438 = vst [vmem:[%s1134_s3] sm:$0xff] %v183_v61  ;;  %v346_v4 = vadd.f32 %v345_v2, %v873_v60 }
  0xfc   :  { %440 = vst [vmem:[%s1134_s3 + $0x10] sm:$0xff] %v344_v0  ;;  %439 = vst [vmem:[%s1134_s3 + $0x8] sm:$0xff] %v185_v1  ;;  %v188_v5 = vpop.f32.mrb[2].mxu0 }
  0xfd   :  { %441 = vst [vmem:[%s1134_s3 + $0x18] sm:$0xff] %v346_v4  ;;  %v189_v6 = vadd.f32 %v188_v5, %v867_v57  ;;  %v349_v7 = vpop.f32.mrb[2].mxu1  ;;  %v190_v8 = vpop.f32.mrb[3].mxu0 }
  0xfe   :  { %v350_v9 = vadd.f32 %v349_v7, %v869_v58  ;;  %v191_v10 = vadd.f32 %v190_v8, %v871_v59  ;;  %v351_v11 = vpop.f32.mrb[3].mxu1 }
  0xff   :  { %442 = vst [vmem:[%s1134_s3 + $0x20] sm:$0xff] %v189_v6  ;;  %v352_v12 = vadd.f32 %v351_v11, %v873_v60 }
 0x100   :  { %444 = vst [vmem:[%s1134_s3 + $0x30] sm:$0xff] %v350_v9  ;;  %443 = vst [vmem:[%s1134_s3 + $0x28] sm:$0xff] %v191_v10  ;;  %v194_v13 = vpop.f32.mrb[4].mxu0 }
 0x101   :  { %445 = vst [vmem:[%s1134_s3 + $0x38] sm:$0xff] %v352_v12  ;;  %v195_v14 = vadd.f32 %v194_v13, %v867_v57  ;;  %v355_v15 = vpop.f32.mrb[4].mxu1  ;;  %v196_v16 = vpop.f32.mrb[5].mxu0 }
 0x102   :  { %v356_v17 = vadd.f32 %v355_v15, %v869_v58  ;;  %v197_v18 = vadd.f32 %v196_v16, %v871_v59  ;;  %v357_v19 = vpop.f32.mrb[5].mxu1 }
 0x103   :  { %446 = vst [vmem:[%s1134_s3 + $0x40] sm:$0xff] %v195_v14  ;;  %v358_v20 = vadd.f32 %v357_v19, %v873_v60 }
 0x104   :  { %448 = vst [vmem:[%s1134_s3 + $0x50] sm:$0xff] %v356_v17  ;;  %447 = vst [vmem:[%s1134_s3 + $0x48] sm:$0xff] %v197_v18  ;;  %v200_v21 = vpop.f32.mrb[6].mxu0 }
 0x105   :  { %449 = vst [vmem:[%s1134_s3 + $0x58] sm:$0xff] %v358_v20  ;;  %v201_v22 = vadd.f32 %v200_v21, %v867_v57  ;;  %v361_v23 = vpop.f32.mrb[6].mxu1  ;;  %v202_v24 = vpop.f32.mrb[7].mxu0 }
 0x106   :  { %v362_v25 = vadd.f32 %v361_v23, %v869_v58  ;;  %v203_v26 = vadd.f32 %v202_v24, %v871_v59  ;;  %v363_v27 = vpop.f32.mrb[7].mxu1 }
 0x107   :  { %450 = vst [vmem:[%s1134_s3 + $0x60] sm:$0xff] %v201_v22  ;;  %v364_v28 = vadd.f32 %v363_v27, %v873_v60 }
 0x108   :  { %452 = vst [vmem:[%s1134_s3 + $0x70] sm:$0xff] %v362_v25  ;;  %451 = vst [vmem:[%s1134_s3 + $0x68] sm:$0xff] %v203_v26  ;;  %v206_v29 = vpop.f32.mrb[8].mxu0 }
 0x109   :  { %453 = vst [vmem:[%s1134_s3 + $0x78] sm:$0xff] %v364_v28  ;;  %v207_v30 = vadd.f32 %v206_v29, %v867_v57  ;;  %v367_v31 = vpop.f32.mrb[8].mxu1  ;;  %v208_v32 = vpop.f32.mrb[9].mxu0 }
 0x10a   :  { %v368_v33 = vadd.f32 %v367_v31, %v869_v58  ;;  %v209_v34 = vadd.f32 %v208_v32, %v871_v59  ;;  %v369_v35 = vpop.f32.mrb[9].mxu1 }
 0x10b   :  { %454 = vst [vmem:[%s1134_s3 + $0x80] sm:$0xff] %v207_v30  ;;  %v370_v36 = vadd.f32 %v369_v35, %v873_v60 }
 0x10c   :  { %456 = vst [vmem:[%s1134_s3 + $0x90] sm:$0xff] %v368_v33  ;;  %455 = vst [vmem:[%s1134_s3 + $0x88] sm:$0xff] %v209_v34  ;;  %v212_v37 = vpop.f32.mrb[10].mxu0 }
 0x10d   :  { %457 = vst [vmem:[%s1134_s3 + $0x98] sm:$0xff] %v370_v36  ;;  %v213_v38 = vadd.f32 %v212_v37, %v867_v57  ;;  %v373_v39 = vpop.f32.mrb[10].mxu1  ;;  %v214_v40 = vpop.f32.mrb[11].mxu0 }
 0x10e   :  { %v374_v41 = vadd.f32 %v373_v39, %v869_v58  ;;  %v215_v42 = vadd.f32 %v214_v40, %v871_v59  ;;  %v375_v43 = vpop.f32.mrb[11].mxu1 }
 0x10f   :  { %458 = vst [vmem:[%s1134_s3 + $0xa0] sm:$0xff] %v213_v38  ;;  %v376_v44 = vadd.f32 %v375_v43, %v873_v60 }
 0x110   :  { %460 = vst [vmem:[%s1134_s3 + $0xb0] sm:$0xff] %v374_v41  ;;  %459 = vst [vmem:[%s1134_s3 + $0xa8] sm:$0xff] %v215_v42  ;;  %v218_v45 = vpop.f32.mrb[12].mxu0 }
 0x111   :  { %461 = vst [vmem:[%s1134_s3 + $0xb8] sm:$0xff] %v376_v44  ;;  %v219_v46 = vadd.f32 %v218_v45, %v867_v57  ;;  %v379_v47 = vpop.f32.mrb[12].mxu1  ;;  %v220_v48 = vpop.f32.mrb[13].mxu0 }
 0x112   :  { %v380_v49 = vadd.f32 %v379_v47, %v869_v58  ;;  %v221_v50 = vadd.f32 %v220_v48, %v871_v59  ;;  %v381_v51 = vpop.f32.mrb[13].mxu1 }
 0x113   :  { %462 = vst [vmem:[%s1134_s3 + $0xc0] sm:$0xff] %v219_v46  ;;  %v382_v52 = vadd.f32 %v381_v51, %v873_v60 }
 0x114   :  { %464 = vst [vmem:[%s1134_s3 + $0xd0] sm:$0xff] %v380_v49  ;;  %463 = vst [vmem:[%s1134_s3 + $0xc8] sm:$0xff] %v221_v50  ;;  %v224_v53 = vpop.f32.mrb[14].mxu0 }
 0x115   :  { %465 = vst [vmem:[%s1134_s3 + $0xd8] sm:$0xff] %v382_v52  ;;  %v225_v54 = vadd.f32 %v224_v53, %v867_v57  ;;  %v385_v55 = vpop.f32.mrb[14].mxu1  ;;  %v226_v56 = vpop.f32.mrb[15].mxu0 }
 0x116   :  { %v386_v3 = vadd.f32 %v385_v55, %v869_v58  ;;  %v227_v61 = vadd.f32 %v226_v56, %v871_v59  ;;  %v387_v62 = vpop.f32.mrb[15].mxu1 }
 0x117   :  { %466 = vst [vmem:[%s1134_s3 + $0xe0] sm:$0xff] %v225_v54  ;;  %v388_v63 = vadd.f32 %v387_v62, %v873_v60 }
 0x118   :  { %468 = vst [vmem:[%s1134_s3 + $0xf0] sm:$0xff] %v386_v3  ;;  %467 = vst [vmem:[%s1134_s3 + $0xe8] sm:$0xff] %v227_v61  ;;  %v230_v0 = vpop.f32.mrb[16].mxu0 }
 0x119   :  { %469 = vst [vmem:[%s1134_s3 + $0xf8] sm:$0xff] %v388_v63  ;;  %v231_v1 = vadd.f32 %v230_v0, %v867_v57  ;;  %v391_v2 = vpop.f32.mrb[16].mxu1  ;;  %v232_v4 = vpop.f32.mrb[17].mxu0 }
 0x11a   :  { %v392_v5 = vadd.f32 %v391_v2, %v869_v58  ;;  %v233_v6 = vadd.f32 %v232_v4, %v871_v59  ;;  %v393_v7 = vpop.f32.mrb[17].mxu1 }
 0x11b   :  { %470 = vst [vmem:[%s1134_s3 + $0x100] sm:$0xff] %v231_v1  ;;  %v394_v8 = vadd.f32 %v393_v7, %v873_v60 }
 0x11c   :  { %472 = vst [vmem:[%s1134_s3 + $0x110] sm:$0xff] %v392_v5  ;;  %471 = vst [vmem:[%s1134_s3 + $0x108] sm:$0xff] %v233_v6  ;;  %v236_v9 = vpop.f32.mrb[18].mxu0 }
 0x11d   :  { %473 = vst [vmem:[%s1134_s3 + $0x118] sm:$0xff] %v394_v8  ;;  %v237_v10 = vadd.f32 %v236_v9, %v867_v57  ;;  %v397_v11 = vpop.f32.mrb[18].mxu1  ;;  %v238_v12 = vpop.f32.mrb[19].mxu0 }
 0x11e   :  { %v398_v13 = vadd.f32 %v397_v11, %v869_v58  ;;  %v239_v14 = vadd.f32 %v238_v12, %v871_v59  ;;  %v399_v15 = vpop.f32.mrb[19].mxu1 }
 0x11f   :  { %474 = vst [vmem:[%s1134_s3 + $0x120] sm:$0xff] %v237_v10  ;;  %v400_v16 = vadd.f32 %v399_v15, %v873_v60 }
 0x120   :  { %476 = vst [vmem:[%s1134_s3 + $0x130] sm:$0xff] %v398_v13  ;;  %475 = vst [vmem:[%s1134_s3 + $0x128] sm:$0xff] %v239_v14  ;;  %v242_v17 = vpop.f32.mrb[20].mxu0 }
 0x121   :  { %477 = vst [vmem:[%s1134_s3 + $0x138] sm:$0xff] %v400_v16  ;;  %v243_v18 = vadd.f32 %v242_v17, %v867_v57  ;;  %v403_v19 = vpop.f32.mrb[20].mxu1  ;;  %v244_v20 = vpop.f32.mrb[21].mxu0 }
 0x122   :  { %v404_v21 = vadd.f32 %v403_v19, %v869_v58  ;;  %v245_v22 = vadd.f32 %v244_v20, %v871_v59  ;;  %v405_v23 = vpop.f32.mrb[21].mxu1 }
 0x123   :  { %478 = vst [vmem:[%s1134_s3 + $0x140] sm:$0xff] %v243_v18  ;;  %v406_v24 = vadd.f32 %v405_v23, %v873_v60 }
 0x124   :  { %480 = vst [vmem:[%s1134_s3 + $0x150] sm:$0xff] %v404_v21  ;;  %479 = vst [vmem:[%s1134_s3 + $0x148] sm:$0xff] %v245_v22  ;;  %v248_v25 = vpop.f32.mrb[22].mxu0 }
 0x125   :  { %481 = vst [vmem:[%s1134_s3 + $0x158] sm:$0xff] %v406_v24  ;;  %v249_v26 = vadd.f32 %v248_v25, %v867_v57  ;;  %v409_v27 = vpop.f32.mrb[22].mxu1  ;;  %v250_v28 = vpop.f32.mrb[23].mxu0 }
 0x126   :  { %v410_v29 = vadd.f32 %v409_v27, %v869_v58  ;;  %v251_v30 = vadd.f32 %v250_v28, %v871_v59  ;;  %v411_v31 = vpop.f32.mrb[23].mxu1 }
 0x127   :  { %482 = vst [vmem:[%s1134_s3 + $0x160] sm:$0xff] %v249_v26  ;;  %v412_v32 = vadd.f32 %v411_v31, %v873_v60 }
 0x128   :  { %484 = vst [vmem:[%s1134_s3 + $0x170] sm:$0xff] %v410_v29  ;;  %483 = vst [vmem:[%s1134_s3 + $0x168] sm:$0xff] %v251_v30  ;;  %v254_v33 = vpop.f32.mrb[24].mxu0 }
 0x129   :  { %485 = vst [vmem:[%s1134_s3 + $0x178] sm:$0xff] %v412_v32  ;;  %v255_v34 = vadd.f32 %v254_v33, %v867_v57  ;;  %v415_v35 = vpop.f32.mrb[24].mxu1  ;;  %v256_v36 = vpop.f32.mrb[25].mxu0 }
 0x12a   :  { %v416_v37 = vadd.f32 %v415_v35, %v869_v58  ;;  %v257_v38 = vadd.f32 %v256_v36, %v871_v59  ;;  %v417_v39 = vpop.f32.mrb[25].mxu1 }
 0x12b   :  { %486 = vst [vmem:[%s1134_s3 + $0x180] sm:$0xff] %v255_v34  ;;  %v418_v40 = vadd.f32 %v417_v39, %v873_v60 }
 0x12c   :  { %488 = vst [vmem:[%s1134_s3 + $0x190] sm:$0xff] %v416_v37  ;;  %487 = vst [vmem:[%s1134_s3 + $0x188] sm:$0xff] %v257_v38  ;;  %v260_v41 = vpop.f32.mrb[26].mxu0 }
 0x12d   :  { %489 = vst [vmem:[%s1134_s3 + $0x198] sm:$0xff] %v418_v40  ;;  %v261_v42 = vadd.f32 %v260_v41, %v867_v57  ;;  %v421_v43 = vpop.f32.mrb[26].mxu1  ;;  %v262_v44 = vpop.f32.mrb[27].mxu0 }
 0x12e   :  { %v422_v45 = vadd.f32 %v421_v43, %v869_v58  ;;  %v263_v46 = vadd.f32 %v262_v44, %v871_v59  ;;  %v423_v47 = vpop.f32.mrb[27].mxu1 }
 0x12f   :  { %490 = vst [vmem:[%s1134_s3 + $0x1a0] sm:$0xff] %v261_v42  ;;  %v424_v48 = vadd.f32 %v423_v47, %v873_v60 }
 0x130   :  { %492 = vst [vmem:[%s1134_s3 + $0x1b0] sm:$0xff] %v422_v45  ;;  %491 = vst [vmem:[%s1134_s3 + $0x1a8] sm:$0xff] %v263_v46  ;;  %v266_v49 = vpop.f32.mrb[28].mxu0 }
 0x131   :  { %493 = vst [vmem:[%s1134_s3 + $0x1b8] sm:$0xff] %v424_v48  ;;  %v267_v50 = vadd.f32 %v266_v49, %v867_v57  ;;  %v427_v51 = vpop.f32.mrb[28].mxu1  ;;  %v268_v52 = vpop.f32.mrb[29].mxu0 }
 0x132   :  { %v428_v53 = vadd.f32 %v427_v51, %v869_v58  ;;  %v269_v54 = vadd.f32 %v268_v52, %v871_v59  ;;  %v429_v55 = vpop.f32.mrb[29].mxu1 }
 0x133   :  { %494 = vst [vmem:[%s1134_s3 + $0x1c0] sm:$0xff] %v267_v50  ;;  %v430_v56 = vadd.f32 %v429_v55, %v873_v60 }
 0x134   :  { %496 = vst [vmem:[%s1134_s3 + $0x1d0] sm:$0xff] %v428_v53  ;;  %495 = vst [vmem:[%s1134_s3 + $0x1c8] sm:$0xff] %v269_v54  ;;  %v272_v3 = vpop.f32.mrb[30].mxu0 }
 0x135   :  { %497 = vst [vmem:[%s1134_s3 + $0x1d8] sm:$0xff] %v430_v56  ;;  %v273_v61 = vadd.f32 %v272_v3, %v867_v57  ;;  %v433_v62 = vpop.f32.mrb[30].mxu1  ;;  %v274_v63 = vpop.f32.mrb[31].mxu0 }
 0x136   :  { %v434_v0 = vadd.f32 %v433_v62, %v869_v58  ;;  %v275_v1 = vadd.f32 %v274_v63, %v871_v59  ;;  %v435_v2 = vpop.f32.mrb[31].mxu1 }
 0x137   :  { %498 = vst [vmem:[%s1134_s3 + $0x1e0] sm:$0xff] %v273_v61  ;;  %v436_v4 = vadd.f32 %v435_v2, %v873_v60 }
 0x138   :  { %500 = vst [vmem:[%s1134_s3 + $0x1f0] sm:$0xff] %v434_v0  ;;  %499 = vst [vmem:[%s1134_s3 + $0x1e8] sm:$0xff] %v275_v1 }
 0x139   :  { %501 = vst [vmem:[%s1134_s3 + $0x1f8] sm:$0xff] %v436_v4 }

</bundles_post_ra>
